<compile_context>
chip_gen: v5e
topology: v5e:2x2
jax: 0.10.0
libtpu: 0.0.40
codegen_flags: <defaults>
</compile_context>

<pallas_src>
import jax
import jax.numpy as jnp
import numpy as np
from jax.experimental import pallas as pl
from jax.experimental.pallas import tpu as pltpu


# ---------------------------------------------------------------------------
# Fused Pallas kernel: one batch element per grid step.
# ---------------------------------------------------------------------------
def _cross_attention_kernel(x_ref, y_ref, wq_ref, wk_ref, wv_ref,
                            bq_ref, bk_ref, bv_ref, g_ref, o_ref):
    x = x_ref[...]                                   # (C, N)  query source + residual
    y = y_ref[...]                                   # (C, N)  key / value source
    f32 = jnp.float32

    # 1x1 convs == channel-mixing matmuls; N stays in the lane dimension.
    q = jnp.dot(wq_ref[...], x, preferred_element_type=f32) + bq_ref[...]   # (C8, N)
    k = jnp.dot(wk_ref[...], y, preferred_element_type=f32) + bk_ref[...]   # (C8, N)
    v = jnp.dot(wv_ref[...], y, preferred_element_type=f32) + bv_ref[...]   # (C,  N)

    # energy^T[j, i] = sum_c k[c, j] * q[c, i]   (== (Q^T K)^T), contraction over C8.
    eT = jax.lax.dot_general(k, q, (((0,), (0,)), ((), ())),
                             preferred_element_type=f32)                    # (Nk, Nq)

    # Softmax over the key axis (axis 0); normalization deferred past the AV matmul.
    m = jnp.max(eT, axis=0, keepdims=True)                                  # (1, Nq)
    p = jnp.exp(eT - m)                                                     # (Nk, Nq)
    s = jnp.sum(p, axis=0, keepdims=True)                                   # (1, Nq)

    # out[c, i] = (sum_j v[c, j] * p[j, i]) * (1 / s[i])  -- plain MXU matmul, no transposes.
    out = jnp.dot(v, p, preferred_element_type=f32)                         # (C, Nq)
    out = out * pl.reciprocal(s, approx=False)

    o_ref[...] = (g_ref[...] * out + x).astype(o_ref.dtype)


# ---------------------------------------------------------------------------
# Wrapper
# ---------------------------------------------------------------------------
def cross_attention_forward(x_nchw, y_nchw, params):
    """x, y: (B, C, W, H) NCHW.  Returns (B, C, W, H) = gamma * attn_out + x."""
    B, C, W, H = x_nchw.shape
    N = W * H

    wq = params["wq"][:, :, 0, 0].astype(jnp.float32)       # (C8, C)
    wk = params["wk"][:, :, 0, 0].astype(jnp.float32)       # (C8, C)
    wv = params["wv"][:, :, 0, 0].astype(jnp.float32)       # (C,  C)
    C8 = wq.shape[0]
    bq = params["bq"].reshape(C8, 1).astype(jnp.float32)
    bk = params["bk"].reshape(C8, 1).astype(jnp.float32)
    bv = params["bv"].reshape(C, 1).astype(jnp.float32)
    gamma = params["gamma"].reshape(1, 1).astype(jnp.float32)

    xf = x_nchw.reshape(B, C, N).astype(jnp.float32)        # free reshape, N lane-dense
    yf = y_nchw.reshape(B, C, N).astype(jnp.float32)

    out = pl.pallas_call(
        _cross_attention_kernel,
        out_shape=jax.ShapeDtypeStruct((B, C, N), jnp.float32),
        grid=(B,),
        in_specs=[
            pl.BlockSpec((None, C, N), lambda b: (b, 0, 0)),    # x
            pl.BlockSpec((None, C, N), lambda b: (b, 0, 0)),    # y
            pl.BlockSpec((C8, C), lambda b: (0, 0)),            # wq
            pl.BlockSpec((C8, C), lambda b: (0, 0)),            # wk
            pl.BlockSpec((C, C), lambda b: (0, 0)),             # wv
            pl.BlockSpec((C8, 1), lambda b: (0, 0)),            # bq
            pl.BlockSpec((C8, 1), lambda b: (0, 0)),            # bk
            pl.BlockSpec((C, 1), lambda b: (0, 0)),             # bv
            pl.BlockSpec((1, 1), lambda b: (0, 0)),             # gamma
        ],
        out_specs=pl.BlockSpec((None, C, N), lambda b: (b, 0, 0)),
        compiler_params=pltpu.CompilerParams(dimension_semantics=("parallel",)),
    )(xf, yf, wq, wk, wv, bq, bk, bv, gamma)

    return out.reshape(B, C, W, H)


# ---------------------------------------------------------------------------
# Pure-JAX reference for verification
# ---------------------------------------------------------------------------
def _reference_forward(x, y, params):
    B, C, W, H = x.shape
    N = W * H
    hp = jax.lax.Precision.HIGHEST
    wq = params["wq"][:, :, 0, 0]
    wk = params["wk"][:, :, 0, 0]
    wv = params["wv"][:, :, 0, 0]
    xf = x.reshape(B, C, N)
    yf = y.reshape(B, C, N)
    q = jnp.einsum("oc,bcn->bon", wq, xf, precision=hp) + params["bq"][None, :, None]
    k = jnp.einsum("oc,bcn->bon", wk, yf, precision=hp) + params["bk"][None, :, None]
    v = jnp.einsum("oc,bcn->bon", wv, yf, precision=hp) + params["bv"][None, :, None]
    energy = jnp.einsum("bci,bcj->bij", q, k, precision=hp)            # (B, Nq, Nk)
    attn = jax.nn.softmax(energy, axis=-1)
    out = jnp.einsum("bcj,bij->bci", v, attn, precision=hp)            # (B, C, Nq)
    out = params["gamma"].reshape(1, 1, 1) * out + xf
    return out.reshape(B, C, W, H)


# ---------------------------------------------------------------------------
if __name__ == "__main__":
    # in_dim must be divisible by 8 (query/key project to in_dim // 8).
    B, C, W, H = 2, 32, 16, 16
    C8 = C // 8

    key = jax.random.PRNGKey(0)
    kx, ky_, kwq, kwk, kwv, kbq, kbk, kbv = jax.random.split(key, 8)

    x = jax.random.normal(kx, (B, C, W, H), jnp.float32)
    y = jax.random.normal(ky_, (B, C, W, H), jnp.float32)

    params = {
        "wq": 0.05 * jax.random.normal(kwq, (C8, C, 1, 1), jnp.float32),
        "bq": 0.10 * jax.random.normal(kbq, (C8,), jnp.float32),
        "wk": 0.05 * jax.random.normal(kwk, (C8, C, 1, 1), jnp.float32),
        "bk": 0.10 * jax.random.normal(kbk, (C8,), jnp.float32),
        "wv": 0.10 * jax.random.normal(kwv, (C, C, 1, 1), jnp.float32),
        "bv": 0.10 * jax.random.normal(kbv, (C,), jnp.float32),
        # gamma is zero-initialized in the PyTorch module; use a nonzero value here so
        # the test actually exercises the attention path.
        "gamma": jnp.array([0.5], jnp.float32),
    }

    out = jax.block_until_ready(cross_attention_forward(x, y, params))
    ref = jax.block_until_ready(_reference_forward(x, y, params))

    assert out.shape == (B, C, W, H), out.shape
    np.testing.assert_allclose(np.asarray(out), np.asarray(ref), rtol=1e-3, atol=1e-3)
    print("KERNEL_OK")
</pallas_src>

<mosaic_0001>
module attributes {stable_mosaic.version = 11 : i64} {
  func.func @_cross_attention_kernel(%arg0: i32, %arg1: memref<1x32x256xf32, #tpu.memory_space<vmem>>, %arg2: memref<1x32x256xf32, #tpu.memory_space<vmem>>, %arg3: memref<4x32xf32, #tpu.memory_space<vmem>>, %arg4: memref<4x32xf32, #tpu.memory_space<vmem>>, %arg5: memref<32x32xf32, #tpu.memory_space<vmem>>, %arg6: memref<4x1xf32, #tpu.memory_space<vmem>>, %arg7: memref<4x1xf32, #tpu.memory_space<vmem>>, %arg8: memref<32x1xf32, #tpu.memory_space<vmem>>, %arg9: memref<1x1xf32, #tpu.memory_space<vmem>>, %arg10: memref<1x32x256xf32, #tpu.memory_space<vmem>>) attributes {dimension_semantics = [#tpu.dimension_semantics<parallel>], iteration_bounds = array<i64: 2>, scalar_prefetch = 0 : i64, scratch_operands = 0 : i64, tpu.core_type = #tpu.core_type<tc>, window_params = [{transform_indices = @transform_0, window_bounds = array<i64: 1, 32, 256>}, {transform_indices = @transform_1, window_bounds = array<i64: 1, 32, 256>}, {pipeline_mode = #tpu.pipeline_mode<synchronous>, transform_indices = @transform_2, window_bounds = array<i64: 4, 32>}, {pipeline_mode = #tpu.pipeline_mode<synchronous>, transform_indices = @transform_3, window_bounds = array<i64: 4, 32>}, {pipeline_mode = #tpu.pipeline_mode<synchronous>, transform_indices = @transform_4, window_bounds = array<i64: 32, 32>}, {pipeline_mode = #tpu.pipeline_mode<synchronous>, transform_indices = @transform_5, window_bounds = array<i64: 4, 1>}, {pipeline_mode = #tpu.pipeline_mode<synchronous>, transform_indices = @transform_6, window_bounds = array<i64: 4, 1>}, {pipeline_mode = #tpu.pipeline_mode<synchronous>, transform_indices = @transform_7, window_bounds = array<i64: 32, 1>}, {pipeline_mode = #tpu.pipeline_mode<synchronous>, transform_indices = @transform_8, window_bounds = array<i64: 1, 1>}, {transform_indices = @transform_9, window_bounds = array<i64: 1, 32, 256>}]} {
    %c0 = arith.constant 0 : index
    %c0_0 = arith.constant 0 : index
    %c0_1 = arith.constant 0 : index
    %0 = vector.load %arg1[%c0, %c0_0, %c0_1] : memref<1x32x256xf32, #tpu.memory_space<vmem>>, vector<1x32x256xf32>
    %1 = vector.shape_cast %0 : vector<1x32x256xf32> to vector<32x256xf32>
    %c0_2 = arith.constant 0 : index
    %c0_3 = arith.constant 0 : index
    %c0_4 = arith.constant 0 : index
    %2 = vector.load %arg2[%c0_2, %c0_3, %c0_4] : memref<1x32x256xf32, #tpu.memory_space<vmem>>, vector<1x32x256xf32>
    %3 = vector.shape_cast %2 : vector<1x32x256xf32> to vector<32x256xf32>
    %c0_5 = arith.constant 0 : index
    %c0_6 = arith.constant 0 : index
    %4 = vector.load %arg3[%c0_5, %c0_6] : memref<4x32xf32, #tpu.memory_space<vmem>>, vector<4x32xf32>
    %cst = arith.constant dense<0.000000e+00> : vector<4x256xf32>
    %5 = tpu.matmul %4, %1, %cst {dimension_numbers = #tpu.dot_dimension_numbers<[1], [0], [0], [1], [0, 0, 1, 1], [], []>} : vector<4x32xf32>, vector<32x256xf32>, vector<4x256xf32> -> vector<4x256xf32>
    %c0_7 = arith.constant 0 : index
    %c0_8 = arith.constant 0 : index
    %6 = vector.load %arg6[%c0_7, %c0_8] : memref<4x1xf32, #tpu.memory_space<vmem>>, vector<4x1xf32>
    %7 = vector.broadcast %6 : vector<4x1xf32> to vector<4x256xf32>
    %8 = arith.addf %5, %7 : vector<4x256xf32>
    %c0_9 = arith.constant 0 : index
    %c0_10 = arith.constant 0 : index
    %9 = vector.load %arg4[%c0_9, %c0_10] : memref<4x32xf32, #tpu.memory_space<vmem>>, vector<4x32xf32>
    %cst_11 = arith.constant dense<0.000000e+00> : vector<4x256xf32>
    %10 = tpu.matmul %9, %3, %cst_11 {dimension_numbers = #tpu.dot_dimension_numbers<[1], [0], [0], [1], [0, 0, 1, 1], [], []>} : vector<4x32xf32>, vector<32x256xf32>, vector<4x256xf32> -> vector<4x256xf32>
    %c0_12 = arith.constant 0 : index
    %c0_13 = arith.constant 0 : index
    %11 = vector.load %arg7[%c0_12, %c0_13] : memref<4x1xf32, #tpu.memory_space<vmem>>, vector<4x1xf32>
    %12 = vector.broadcast %11 : vector<4x1xf32> to vector<4x256xf32>
    %13 = arith.addf %10, %12 : vector<4x256xf32>
    %c0_14 = arith.constant 0 : index
    %c0_15 = arith.constant 0 : index
    %14 = vector.load %arg5[%c0_14, %c0_15] : memref<32x32xf32, #tpu.memory_space<vmem>>, vector<32x32xf32>
    %cst_16 = arith.constant dense<0.000000e+00> : vector<32x256xf32>
    %15 = tpu.matmul %14, %3, %cst_16 {dimension_numbers = #tpu.dot_dimension_numbers<[1], [0], [0], [1], [0, 0, 1, 1], [], []>} : vector<32x32xf32>, vector<32x256xf32>, vector<32x256xf32> -> vector<32x256xf32>
    %c0_17 = arith.constant 0 : index
    %c0_18 = arith.constant 0 : index
    %16 = vector.load %arg8[%c0_17, %c0_18] : memref<32x1xf32, #tpu.memory_space<vmem>>, vector<32x1xf32>
    %17 = vector.broadcast %16 : vector<32x1xf32> to vector<32x256xf32>
    %18 = arith.addf %15, %17 : vector<32x256xf32>
    %cst_19 = arith.constant dense<0.000000e+00> : vector<256x256xf32>
    %19 = tpu.matmul %13, %8, %cst_19 {dimension_numbers = #tpu.dot_dimension_numbers<[0], [0], [1], [1], [0, 1, 1, 1], [], []>} : vector<4x256xf32>, vector<4x256xf32>, vector<256x256xf32> -> vector<256x256xf32>
    %cst_20 = arith.constant dense<0xFF800000> : vector<256xf32>
    %20 = vector.multi_reduction <maximumf>, %19, %cst_20 [0] : vector<256x256xf32> to vector<256xf32>
    %21 = vector.shape_cast %20 : vector<256xf32> to vector<1x256xf32>
    %22 = vector.broadcast %21 : vector<1x256xf32> to vector<256x256xf32>
    %23 = arith.subf %19, %22 : vector<256x256xf32>
    %24 = math.exp %23 : vector<256x256xf32>
    %cst_21 = arith.constant dense<0.000000e+00> : vector<256xf32>
    %25 = vector.multi_reduction <add>, %24, %cst_21 [0] : vector<256x256xf32> to vector<256xf32>
    %26 = vector.shape_cast %25 : vector<256xf32> to vector<1x256xf32>
    %cst_22 = arith.constant dense<0.000000e+00> : vector<32x256xf32>
    %27 = tpu.matmul %18, %24, %cst_22 {dimension_numbers = #tpu.dot_dimension_numbers<[1], [0], [0], [1], [0, 0, 1, 1], [], []>} : vector<32x256xf32>, vector<256x256xf32>, vector<32x256xf32> -> vector<32x256xf32>
    %28 = tpu.reciprocal %26 : vector<1x256xf32> -> vector<1x256xf32>
    %29 = vector.broadcast %28 : vector<1x256xf32> to vector<32x256xf32>
    %30 = arith.mulf %27, %29 : vector<32x256xf32>
    %c0_23 = arith.constant 0 : index
    %c0_24 = arith.constant 0 : index
    %31 = vector.load %arg9[%c0_23, %c0_24] : memref<1x1xf32, #tpu.memory_space<vmem>>, vector<1x1xf32>
    %32 = vector.broadcast %31 : vector<1x1xf32> to vector<32x256xf32>
    %33 = arith.mulf %32, %30 : vector<32x256xf32>
    %34 = arith.addf %33, %1 : vector<32x256xf32>
    %c0_25 = arith.constant 0 : index
    %c0_26 = arith.constant 0 : index
    %c0_27 = arith.constant 0 : index
    %35 = vector.load %arg10[%c0_25, %c0_26, %c0_27] : memref<1x32x256xf32, #tpu.memory_space<vmem>>, vector<1x32x256xf32>
    %36 = vector.shape_cast %35 : vector<1x32x256xf32> to vector<32x256xf32>
    %37 = vector.shape_cast %34 : vector<32x256xf32> to vector<1x32x256xf32>
    tpu.vector_store %arg10[%c0_25, %c0_26, %c0_27], %37 {strides = array<i32>} : memref<1x32x256xf32, #tpu.memory_space<vmem>>, vector<1x32x256xf32>,
    return
  }
  func.func @transform_0(%arg0: i32) -> (i32, i32, i32) {
    %c0_i32 = arith.constant 0 : i32
    %c0_i32_0 = arith.constant 0 : i32
    %c0_i32_1 = arith.constant 0 : i32
    return %arg0, %c0_i32, %c0_i32_0 : i32, i32, i32
  }
  func.func @transform_1(%arg0: i32) -> (i32, i32, i32) {
    %c0_i32 = arith.constant 0 : i32
    %c0_i32_0 = arith.constant 0 : i32
    %c0_i32_1 = arith.constant 0 : i32
    return %arg0, %c0_i32, %c0_i32_0 : i32, i32, i32
  }
  func.func @transform_2(%arg0: i32) -> (i32, i32) {
    %c0_i32 = arith.constant 0 : i32
    %c0_i32_0 = arith.constant 0 : i32
    %c0_i32_1 = arith.constant 0 : i32
    return %c0_i32, %c0_i32_0 : i32, i32
  }
  func.func @transform_3(%arg0: i32) -> (i32, i32) {
    %c0_i32 = arith.constant 0 : i32
    %c0_i32_0 = arith.constant 0 : i32
    %c0_i32_1 = arith.constant 0 : i32
    return %c0_i32, %c0_i32_0 : i32, i32
  }
  func.func @transform_4(%arg0: i32) -> (i32, i32) {
    %c0_i32 = arith.constant 0 : i32
    %c0_i32_0 = arith.constant 0 : i32
    %c0_i32_1 = arith.constant 0 : i32
    return %c0_i32, %c0_i32_0 : i32, i32
  }
  func.func @transform_5(%arg0: i32) -> (i32, i32) {
    %c0_i32 = arith.constant 0 : i32
    %c0_i32_0 = arith.constant 0 : i32
    %c0_i32_1 = arith.constant 0 : i32
    return %c0_i32, %c0_i32_0 : i32, i32
  }
  func.func @transform_6(%arg0: i32) -> (i32, i32) {
    %c0_i32 = arith.constant 0 : i32
    %c0_i32_0 = arith.constant 0 : i32
    %c0_i32_1 = arith.constant 0 : i32
    return %c0_i32, %c0_i32_0 : i32, i32
  }
  func.func @transform_7(%arg0: i32) -> (i32, i32) {
    %c0_i32 = arith.constant 0 : i32
    %c0_i32_0 = arith.constant 0 : i32
    %c0_i32_1 = arith.constant 0 : i32
    return %c0_i32, %c0_i32_0 : i32, i32
  }
  func.func @transform_8(%arg0: i32) -> (i32, i32) {
    %c0_i32 = arith.constant 0 : i32
    %c0_i32_0 = arith.constant 0 : i32
    %c0_i32_1 = arith.constant 0 : i32
    return %c0_i32, %c0_i32_0 : i32, i32
  }
  func.func @transform_9(%arg0: i32) -> (i32, i32, i32) {
    %c0_i32 = arith.constant 0 : i32
    %c0_i32_0 = arith.constant 0 : i32
    %c0_i32_1 = arith.constant 0 : i32
    return %arg0, %c0_i32, %c0_i32_0 : i32, i32, i32
  }
}

</mosaic_0001>

<bundles_post_ra>
// kernel: tpu_custom_call.1
= control target key start
LH: loop header
LB: loop body
LE: loop exit
PB: predicated region body
PF: predicated region fallthrough
CT: control target
= control target key end

     0   :  { %s2997_s0 = inlined_call_operand.hbm [shape: f32[2,32,256], index: 0, kind: input, shape index: {}]   ;;  %s2998_s1 = inlined_call_operand.hbm [shape: f32[2,32,256], index: 1, kind: input, shape index: {}]   ;;  %s2999_s2 = inlined_call_operand.vmem [shape: f32[4,32], index: 2, kind: input, shape index: {}]   ;;  %s3000_s3 = inlined_call_operand.vmem [shape: f32[4,32], index: 3, kind: input, shape index: {}]   ;;  %s3001_s4 = inlined_call_operand.vmem [shape: f32[32,32], index: 4, kind: input, shape index: {}]   ;;  %s3002_s5 = inlined_call_operand.vmem [shape: f32[4,1], index: 5, kind: input, shape index: {}]   ;;  %s3003_s6 = inlined_call_operand.vmem [shape: f32[4,1], index: 6, kind: input, shape index: {}]   ;;  %s3004_s7 = inlined_call_operand.vmem [shape: f32[32,1], index: 7, kind: input, shape index: {}]   ;;  %s3005_s8 = inlined_call_operand.<no memory space> [shape: f32[1,1], index: 8, kind: input, shape index: {}]   ;;  %s3006_s9 = inlined_call_operand.hbm [shape: f32[2,32,256], index: 9, kind: output, shape index: {}]  }
   0x1   :  { %3031 = sst [smem:[#allocation42_spill]] %s2997_s0  ;;  %v14_v0 = vstv %s3005_s8 }
   0x2   :  { %15 = vst [vmem:[#allocation2] sm:$0x1] %v14_v0 }
   0x3   :  { %16 = vsyncpa [#allocation4], 0 }
   0x4   :  { %18 = vsyncpa [#allocation4 + $0x1], 0 }
   0x5   :  { %19 = vsyncpa [#allocation7], 0 }
   0x6   :  { %21 = vsyncpa [#allocation7 + $0x1], 0 }
   0x7   :  { %22 = vsyncpa [#allocation5], 0 }
   0x8   :  { %24 = vsyncpa [#allocation5 + $0x1], 0  ;;  %s2133_s11 = smov 0   ;;  %s2135_s12 = smov 0  }
   0x9   :  { %s2137_s13 = smov 0   ;;  %s2139_s14 = smov 0  }
   0xa LB: > { %3032 = sst [smem:[#allocation12_spill]] %s2061_s11  ;;  %s2154_s8 = sadd.s32 4294967295, %s2073_s14   ;;  %s2073_s14 = sphi %s2139_s14, %s3099_s14   ;;  %s2069_s13 = sphi %s2137_s13, %s3101_s13   ;;  %s2065_s12 = sphi %s2135_s12, %s3103_s12   ;;  %s2061_s11 = sphi %s2133_s11, %s3102_s11  }
   0xb   : > { %3033 = sst [smem:[#allocation13_spill]] %s2069_s13  ;;  %s1641_s15 = sadd.s32 4294967294, %s2073_s14  }
   0xc   : > { %s2158_s16 = sadd.s32 1, %s2073_s14   ;;  %s37_s17 = sadd.s32 1, %s2069_s13 }
   0xd   : > { %3034 = sst [smem:[#allocation14_spill]] %s2158_s16  ;;  %s34_s18 = ssub.s32 %s2073_s14, %s2158_s16 }
   0xe   : > { %p44_p0 = scmp.ne.s32.totalorder %s2069_s13, %s2065_s12  ;;  %p35_p1 = scmp.eq.s32.totalorder %s34_s18, 0 }
   0xf   : > { %p45_p2 = scmp.eq.s32.totalorder %s2073_s14, 0  ;;  %p50_p3 = scmp.ne.s32.totalorder %s2065_s12, %s2061_s11 }
  0x10   : > { %p51_p4 = scmp.eq.s32.totalorder %s2154_s8, 0  ;;  %p247_p7 = scmp.eq.s32.totalorder %s2154_s8, 1 }
  0x11   : > { %s2170_s19 = scalar_select %p35_p1, %s2069_s13, %s37_s17  }
  0x12   : > { %p2172_p5 = por %p45_p2, %p44_p0  ;;  %p2176_p6 = por %p51_p4, %p50_p3 }
  0x13   : > { %3035 = sst [smem:[#allocation15_spill]] %s2170_s19  ;;  %p253_p8 = scmp.eq.s32.totalorder %s1641_s15, 1 }
  0x14   : > { %p1759_p10 = scmp.lt.s32.totalorder %s2073_s14, 2  ;;  %p2183_p11 = por %p247_p7, %p44_p0 }
  0x15   : > { %p2187_p12 = por %p253_p8, %p50_p3  ;;  %s2192_s24 = sand.u32 1, %s2069_s13  }
  0x16   : > { %s3008_s25 = sshll.u32 %s2073_s14, 6  ;;  %s3007_s26 = sshll.u32 %s2192_s24, 6 }
  0x17   : > { %s3039_s23 = scalar_select %p2187_p12, 1, 0 }
  0x18   : > { %s3041_s0 = sld [smem:[#allocation42_spill]]  ;;  %s298_s10 = scalar_lea.vmem [#allocation3], %s3007_s26 }
  0x19   : > { %3040 = sst [smem:[#allocation16_spill]] %s3039_s23  ;;  %s306_s15 = sshll.u32 %s298_s10, 4  ;;  %s307_s15 = int_to_ptr.vmem [resolvable:$true] %s306_s15 }
  0x1a   : > { %p2205_p13 = pnand %p1759_p10, %p2172_p5  ;;  %p1650_p0 = scmp.ge.s32.totalorder %s2073_s14, 1 }
  0x1b   : > { %p336_p1 = scmp.lt.s32.totalorder %s2073_s14, 3  ;;  %s295_s18 = scalar_lea.sflag [#allocation4], %s2192_s24 }
  0x1c   : > { %p1947_p3 = pneg %p2205_p13 }
  0x1e   : > { %s303_s29 = scalar_lea.hbm %s3041_s0, %s3008_s25 }
  0x1f   : > { %s304_s30 = sshll.u32 %s303_s29, 4  ;;  %s1950_s29 = scalar_lea.hbm %s3041_s0, 128  ;;  %s305_s30 = int_to_ptr.hbm [resolvable:$true] %s304_s30 }
  0x20   : > { %s1943_s19 = sshra.s32 %s305_s30, 4  ;;  %s1944_s19 = int_to_ptr.hbm [resolvable:$true] %s1943_s19 }
  0x21   : > { %s1945_s27 = scalar_lea.hbm %s1944_s19, 64  ;;  %p1951_p5 = scmp.lt.s32.totalorder %s1944_s19, %s3041_s0 }
  0x22   : > { %p1946_p2 = scmp.ne.s32.totalorder %s1944_s19, %s1945_s27  ;;  %p1952_p8 = scmp.lt.s32.totalorder %s1950_s29, %s1945_s27 }
  0x24   : > { %p1948_p4 = pnand %p1947_p3, %p1946_p2  ;;  %p1953_p10 = por %p1952_p8, %p1951_p5 }
  0x26   : > { %p1949_p7 = pneg %p1948_p4 }
  0x28   : > { %p1954_p9 = pnand %p1953_p10, %p1949_p7 }
  0x2a   : > { %1957 = shalt.err (!%p1954_p9)
}
  0x2b   : > { %s2075_s25 = smov 256   ;;  %s2076_s13 = smov 16  }
  0x2c   : > { %1751 = dma.hbm_to_vmem [thread:$0]  (!%p2205_p13), %s305_s30, 1024, %s307_s15, %s295_s18, %s2075_s25, %s2075_s25, %s2076_s13  }
  0x2d   : > { %p2229_p2 = pnand %p1650_p0, %p336_p1  ;;  %s3044_s19 = sshll.u32 %s2073_s14, 6 }
  0x2e   : > { %s325_s28 = scalar_lea.hbm %s2998_s1, %s3044_s19  ;;  %s3045_s10 = sshll.u32 %s2192_s24, 6 }
  0x2f   : > { %s326_s29 = sshll.u32 %s325_s28, 4  ;;  %s320_s0 = scalar_lea.vmem [#allocation6], %s3045_s10  ;;  %s327_s29 = int_to_ptr.hbm [resolvable:$true] %s326_s29 }
  0x30   : > { %s328_s16 = sshll.u32 %s320_s0, 4  ;;  %s317_s23 = scalar_lea.sflag [#allocation7], %s2192_s24  ;;  %s329_s16 = int_to_ptr.vmem [resolvable:$true] %s328_s16 }
  0x31   : > { %s1973_s11 = sshra.s32 %s327_s29, 4  ;;  %s1980_s27 = scalar_lea.hbm %s2998_s1, 128  ;;  %s1974_s11 = int_to_ptr.hbm [resolvable:$true] %s1973_s11 }
  0x32   : > { %s1975_s30 = scalar_lea.hbm %s1974_s11, 64  ;;  %p1981_p4 = scmp.lt.s32.totalorder %s1974_s11, %s2998_s1 }
  0x33   : > { %p1976_p9 = scmp.ne.s32.totalorder %s1974_s11, %s1975_s30  ;;  %p1982_p7 = scmp.lt.s32.totalorder %s1980_s27, %s1975_s30 }
  0x35   : > { %p1978_p0 = pnand %p1976_p9, %p1947_p3  ;;  %p1983_p5 = por %p1982_p7, %p1981_p4 }
  0x37   : > { %p1979_p1 = pneg %p1978_p0 }
  0x39   : > { %p1984_p8 = pnand %p1983_p5, %p1979_p1 }
  0x3b   : > { %1987 = shalt.err (!%p1984_p8)
}
  0x3c   : > { %1754 = dma.hbm_to_vmem [thread:$0]  (!%p2205_p13), %s327_s29, 1024, %s329_s16, %s317_s23, %s2075_s25, %s2075_s25, %s2076_s13  }
  0x3d   : > { %340 = sbr.rel (%p2229_p2) target bundleno = 1041 (0x411), region = 56 }
  0x42   : > { %s2255_s0 = sand.u32 1, %s2065_s12  }
  0x43   : > { %s2258_s24 = sshll.u32 %s2255_s0, 6  ;;  %s343_s11 = scalar_lea.sflag [#allocation4], %s2255_s0 }
  0x44   : > { %s2262_s28 = scalar_lea.vmem [#allocation3], %s2258_s24 }
  0x45   : > { %2048 = dma.done.wait (%p2176_p6), %s343_s11, 1024  }
  0x46   : > { %2050 = vsyncadd (%p2176_p6), %s343_s11, 4294966272  ;;  %s353_s13 = scalar_lea.sflag [#allocation7], %s2255_s0  ;;  %s356_s16 = scalar_lea.vmem [#allocation6], %s2258_s24 }
  0x47   : > { %2052 = dma.done.wait (%p2176_p6), %s353_s13, 1024  }
  0x48   : > { %2054 = vsyncadd (%p2176_p6), %s353_s13, 4294966272  ;;  %v2077_v1 = vmov 0   ;;  %v411_v2 = vld [vmem:[%s356_s16 + $0x30] sm:$0xff]  ;;  %v412_v3 = vld [vmem:[%s356_s16 + $0x38] sm:$0xff]  ;;  %vm420_vm0 = vcmask 261120   ;;  %vm773_vm1 = vcmask 1043456  }
  0x49   : > { %1799 = vset.pattern.permute.xlu0 %v2077_v1  ;;  %1800 = vset.pattern.permute.xlu1 %v2077_v1  ;;  %v409_v4 = vld [vmem:[%s356_s16 + $0x20] sm:$0xff]  ;;  %v410_v5 = vld [vmem:[%s356_s16 + $0x28] sm:$0xff]  ;;  %v407_v6 = vld [vmem:[%s356_s16 + $0x10] sm:$0xff]  ;;  %vm676_vm2 = vcmask 31744   ;;  %s2939_s15 = scalar_lea.vmem [#allocation8], %s2258_s24  ;;  %s1739_s24 = sshll.u32 %s2154_s8, 6 }
  0x4a   : > { %1801 = vset.pattern.permute.xlu2 %v2077_v1  ;;  %486 = vmatpush.msra.mxu2 %v411_v2  ;;  %v408_v7 = vld [vmem:[%s356_s16 + $0x18] sm:$0xff]  ;;  %v405_v10 = vld [vmem:[%s356_s16] sm:$0xff]  ;;  %v406_v11 = vld [vmem:[%s356_s16 + $0x8] sm:$0xff]  ;;  %s1541_s19 = scalar_lea.hbm %s3006_s9, %s1739_s24  ;;  %s1542_s20 = sshll.u32 %s2939_s15, 4  ;;  %s1543_s20 = int_to_ptr.vmem [resolvable:$true] %s1542_s20 }
  0x4b   : > { %506 = vmatpush.msra.mxu3 %v412_v3  ;;  %v465_v8 = vld [vmem:[%s3003_s6] sm:$0xf]  ;;  %v403_v13 = vld [vmem:[%s2262_s28 + $0x30] sm:$0xff]  ;;  %v402_v16 = vld [vmem:[%s2262_s28 + $0x28] sm:$0xff]  ;;  %s1544_s11 = sshll.u32 %s1541_s19, 4  ;;  %s1530_s8 = scalar_lea.sflag [#allocation5], %s2255_s0  ;;  %s1545_s11 = int_to_ptr.hbm [resolvable:$true] %s1544_s11 }
  0x4c   : > { %487 = vmatpush.msra.mxu2 %v409_v4  ;;  %v414_v9 = vld [vmem:[%s3002_s5] sm:$0xf]  ;;  %468 = vperm.xlu0 %1799, %v465_v8   ;;  %v399_v17 = vld [vmem:[%s2262_s28 + $0x10] sm:$0xff]  ;;  %v398_v20 = vld [vmem:[%s2262_s28 + $0x8] sm:$0xff]  ;;  %s2017_s13 = sshra.s32 %s1545_s11, 4  ;;  %s2023_s21 = scalar_lea.hbm %s3006_s9, 128  ;;  %s2018_s13 = int_to_ptr.hbm [resolvable:$true] %s2017_s13 }
  0x4d   : > { %507 = vmatpush.msra.mxu3 %v410_v5  ;;  %417 = vperm.xlu1 %1800, %v414_v9   ;;  %v464_v12 = vld [vmem:[%s3000_s3] sm:$0xf]  ;;  %v515_v23 = vld [vmem:[%s3001_s4 + $0x8] sm:$0xff]  ;;  %v516_v29 = vld [vmem:[%s3001_s4 + $0x10] sm:$0xff]  ;;  %s2019_s16 = scalar_lea.hbm %s2018_s13, 64  ;;  %p2024_p10 = scmp.lt.s32.totalorder %s2018_s13, %s3006_s9 }
  0x4e   : > { %488 = vmatpush.msra.mxu2 %v407_v6  ;;  %v404_v14 = vld [vmem:[%s2262_s28 + $0x38] sm:$0xff]  ;;  %v401_v15 = vld [vmem:[%s2262_s28 + $0x20] sm:$0xff]  ;;  %436 = vmatpush.msra.mxu0 %v403_v13  ;;  %v520_v60 = vld [vmem:[%s3004_s7 + $0x10] sm:$0xff]  ;;  %p2020_p6 = scmp.ne.s32.totalorder %s2018_s13, %s2019_s16  ;;  %p2025_p2 = scmp.lt.s32.totalorder %s2023_s21, %s2019_s16 }
  0x4f   : > { %508 = vmatpush.msra.mxu3 %v408_v7  ;;  %456 = vmatpush.msra.mxu1 %v404_v14  ;;  %v400_v18 = vld [vmem:[%s2262_s28 + $0x18] sm:$0xff]  ;;  %v397_v19 = vld [vmem:[%s2262_s28] sm:$0xff] }
  0x50   : > { %489 = vmatpush.msra.mxu2 %v405_v10  ;;  %437 = vmatpush.msra.mxu0 %v401_v15  ;;  %v413_v21 = vld [vmem:[%s2999_s2] sm:$0xf]  ;;  %v517_v30 = vld [vmem:[%s3001_s4 + $0x18] sm:$0xff]  ;;  %v519_v58 = vld [vmem:[%s3004_s7 + $0x8] sm:$0xff]  ;;  %p2021_p13 = pnand %p2020_p6, %p2183_p11  ;;  %p2026_p9 = por %p2025_p2, %p2024_p10 }
  0x51   : > { %509 = vmatpush.msra.mxu3 %v406_v11  ;;  %1656 = vmatmul.msk.f32.vlgmr.msra.gmra.mxu2 %vm420_vm0, %v464_v12  ;;  %v514_v22 = vld [vmem:[%s3001_s4] sm:$0xff]  ;;  %v521_v61 = vld [vmem:[%s3004_s7 + $0x18] sm:$0xff] }
  0x52   : > { %1657 = vmatmul.msk.f32.vlgmr.msra.gmra.mxu3 %vm420_vm0, %v464_v12  ;;  %457 = vmatpush.msra.mxu1 %v402_v16  ;;  %v518_v56 = vld [vmem:[%s3004_s7] sm:$0xff]  ;;  %p2022_p3 = pneg %p2021_p13 }
  0x53   : > { %438 = vmatpush.msra.mxu0 %v399_v17  ;;  %524 = vperm.xlu2 %1801, %v518_v56  }
  0x54   : > { %458 = vmatpush.msra.mxu1 %v400_v18  ;;  %p2027_p0 = pnand %p2026_p9, %p2022_p3 }
  0x55   : > { %439 = vmatpush.msra.mxu0 %v397_v19 }
  0x56   : > { %459 = vmatpush.msra.mxu1 %v398_v20  ;;  %1654 = vmatmul.msk.f32.vlgmr.msra.gmra.mxu0 %vm420_vm0, %v413_v21 }
  0x57   : > { %1655 = vmatmul.msk.f32.vlgmr.msra.gmra.mxu1 %vm420_vm0, %v413_v21  ;;  %566 = vmatpush.msrb.mxu0 %v411_v2 }
  0x58   : > { %595 = vmatpush.msrb.mxu1 %v412_v3 }
  0x59   : > { %567 = vmatpush.msrb.mxu0 %v409_v4 }
  0x5a   : > { %596 = vmatpush.msrb.mxu1 %v410_v5 }
  0x5b   : > { %568 = vmatpush.msrb.mxu0 %v407_v6  ;;  %529 = vperm.xlu2 %1801, %v519_v58  }
  0x5c   : > { %597 = vmatpush.msrb.mxu1 %v408_v7 }
  0x5d   : > { %569 = vmatpush.msrb.mxu0 %v405_v10 }
  0x5e   : > { %598 = vmatpush.msrb.mxu1 %v406_v11  ;;  %1658 = vmatmul.msk.f32.vlgmr.msrb.gmra.mxu0 %vm420_vm0, %v514_v22 }
  0x5f   : > { %1662 = vmatmul.msk.f32.vlgmr.msrb.gmra.mxu1 %vm420_vm0, %v514_v22 }
  0x63   : > { %534 = vperm.xlu2 %1801, %v520_v60  }
  0x66   : > { %1659 = vmatmul.msk.f32.gmra.mxu0 %vm420_vm0, %v515_v23 }
  0x67   : > { %1663 = vmatmul.msk.f32.gmra.mxu1 %vm420_vm0, %v515_v23 }
  0x6b   : > { %539 = vperm.xlu2 %1801, %v521_v61  }
  0x6e   : > { %1660 = vmatmul.msk.f32.gmra.mxu0 %vm420_vm0, %v516_v29 }
  0x6f   : > { %1664 = vmatmul.msk.f32.gmra.mxu1 %vm420_vm0, %v516_v29 }
  0x76   : > { %1661 = vmatmul.msk.f32.gmra.mxu0 %vm420_vm0, %v517_v30 }
  0x77   : > { %1665 = vmatmul.msk.f32.gmra.mxu1 %vm420_vm0, %v517_v30 }
  0xbe   : > { %v469_v24 = vpop.permute.xlu0 %468 }
  0xbf   : > { %v418_v31 = vpop.permute.xlu1 %417 }
  0xd3   : > { %v441_v32 = vpop.f32.mrf.mxu0 }
  0xd4   : > { %v491_v25 = vpop.f32.mrf.mxu2  ;;  %v461_v33 = vpop.f32.mrf.mxu1  ;;  %v442_v34 = vadd.f32 %v441_v32, %v418_v31 }
  0xd5   : > { %v511_v26 = vpop.f32.mrf.mxu3  ;;  %v492_v27 = vadd.f32 %v491_v25, %v469_v24  ;;  %v462_v35 = vadd.f32 %v461_v33, %v418_v31 }
  0xd6   : > { %v512_v28 = vadd.f32 %v511_v26, %v469_v24  ;;  %1666 = vmatpush.msk.msra.mxu0 %vm773_vm1, %v442_v34  ;;  %1740 = vmatpush.msk.msrb.mxu2 %vm773_vm1, %v442_v34 }
  0xd7   : > { %612 = vxpose.xlu0.b32.start.end [1/1] (short) %v492_v27, 128  ;;  %1699 = vmatpush.msk.msra.mxu1 %vm773_vm1, %v462_v35 }
  0xd8   : > { %644 = vxpose.xlu1.b32.start.end [1/1] (short) %v512_v28, 128  ;;  %1741 = vmatpush.msk.msrb.mxu3 %vm773_vm1, %v462_v35 }
  0xdb   : > { %v2394_v9 = vpop.f32.mrf.mxu0 }
  0xdc   : > { %3047 = vst [vmem:[#allocation18_spill] sm:$0xff] %v2394_v9  ;;  %v2412_v17 = vpop.f32.mrf.mxu1 }
  0xdd   : > { %3051 = vst [vmem:[#allocation22_spill] sm:$0xff] %v2412_v17 }
  0xe3   : > { %v2404_v13 = vpop.f32.mrf.mxu0 }
  0xe4   : > { %3050 = vst [vmem:[#allocation21_spill] sm:$0xff] %v2404_v13  ;;  %v2426_v24 = vpop.f32.mrf.mxu1 }
  0xe5   : > { %3053 = vst [vmem:[#allocation24_spill] sm:$0xff] %v2426_v24 }
  0xeb   : > { %v2418_v20 = vpop.f32.mrf.mxu0 }
  0xec   : > { %3052 = vst [vmem:[#allocation23_spill] sm:$0xff] %v2418_v20  ;;  %v2434_v28 = vpop.f32.mrf.mxu1 }
  0xed   : > { %3055 = vst [vmem:[#allocation26_spill] sm:$0xff] %v2434_v28 }
  0xf3   : > { %v2428_v25 = vpop.f32.mrf.mxu0 }
  0xf4   : > { %3054 = vst [vmem:[#allocation25_spill] sm:$0xff] %v2428_v25  ;;  %v2442_v32 = vpop.f32.mrf.mxu1 }
  0xf5   : > { %3056 = vst [vmem:[#allocation27_spill] sm:$0xff] %v2442_v32 }
 0x17b   : > { %v628_v36 = vpop.trf.xlu0 }
 0x17c   : > { %1667 = vmatmul.msk.f32.vlgmr.msra.gmra.mxu0 %vm676_vm2, %v628_v36  ;;  %1700 = vmatmul.msk.f32.vlgmr.msra.gmra.mxu1 %vm676_vm2, %v628_v36  ;;  %v660_v48 = vpop.trf.xlu1 }
 0x183   : > { %v629_v37 = vpop.trf.xlu0 }
 0x184   : > { %1668 = vmatmul.msk.f32.gmra.mxu0 %vm676_vm2, %v629_v37  ;;  %1701 = vmatmul.msk.f32.gmra.mxu1 %vm676_vm2, %v629_v37  ;;  %v661_v51 = vpop.trf.xlu1 }
 0x18b   : > { %v630_v38 = vpop.trf.xlu0 }
 0x18c   : > { %1669 = vmatmul.msk.f32.gmra.mxu0 %vm676_vm2, %v630_v38  ;;  %1702 = vmatmul.msk.f32.gmra.mxu1 %vm676_vm2, %v630_v38  ;;  %v662_v53 = vpop.trf.xlu1 }
 0x193   : > { %v631_v39 = vpop.trf.xlu0 }
 0x194   : > { %1670 = vmatmul.msk.f32.gmra.mxu0 %vm676_vm2, %v631_v39  ;;  %1703 = vmatmul.msk.f32.gmra.mxu1 %vm676_vm2, %v631_v39  ;;  %v663_v55 = vpop.trf.xlu1 }
 0x19b   : > { %v632_v40 = vpop.trf.xlu0 }
 0x19c   : > { %1671 = vmatmul.msk.f32.gmra.mxu0 %vm676_vm2, %v632_v40  ;;  %1704 = vmatmul.msk.f32.gmra.mxu1 %vm676_vm2, %v632_v40  ;;  %v664_v57 = vpop.trf.xlu1 }
 0x1a3   : > { %v633_v41 = vpop.trf.xlu0 }
 0x1a4   : > { %1672 = vmatmul.msk.f32.gmra.mxu0 %vm676_vm2, %v633_v41  ;;  %1705 = vmatmul.msk.f32.gmra.mxu1 %vm676_vm2, %v633_v41  ;;  %v665_v59 = vpop.trf.xlu1 }
 0x1ab   : > { %v634_v42 = vpop.trf.xlu0 }
 0x1ac   : > { %1673 = vmatmul.msk.f32.gmra.mxu0 %vm676_vm2, %v634_v42  ;;  %1706 = vmatmul.msk.f32.gmra.mxu1 %vm676_vm2, %v634_v42  ;;  %v666_v62 = vpop.trf.xlu1 }
 0x1b3   : > { %v635_v43 = vpop.trf.xlu0 }
 0x1b4   : > { %1674 = vmatmul.msk.f32.gmra.mxu0 %vm676_vm2, %v635_v43  ;;  %1707 = vmatmul.msk.f32.gmra.mxu1 %vm676_vm2, %v635_v43  ;;  %v667_v63 = vpop.trf.xlu1 }
 0x1bb   : > { %v636_v44 = vpop.trf.xlu0 }
 0x1bc   : > { %1675 = vmatmul.msk.f32.gmra.mxu0 %vm676_vm2, %v636_v44  ;;  %1708 = vmatmul.msk.f32.gmra.mxu1 %vm676_vm2, %v636_v44  ;;  %v668_v0 = vpop.trf.xlu1 }
 0x1c3   : > { %v637_v45 = vpop.trf.xlu0 }
 0x1c4   : > { %1676 = vmatmul.msk.f32.gmra.mxu0 %vm676_vm2, %v637_v45  ;;  %1709 = vmatmul.msk.f32.gmra.mxu1 %vm676_vm2, %v637_v45  ;;  %v669_v1 = vpop.trf.xlu1 }
 0x1cb   : > { %v638_v46 = vpop.trf.xlu0 }
 0x1cc   : > { %1677 = vmatmul.msk.f32.vlgmr.msrb.gmra.mxu2 %vm676_vm2, %v638_v46  ;;  %1710 = vmatmul.msk.f32.vlgmr.msrb.gmra.mxu3 %vm676_vm2, %v638_v46  ;;  %v670_v2 = vpop.trf.xlu1 }
 0x1d3   : > { %v639_v47 = vpop.trf.xlu0 }
 0x1d4   : > { %1678 = vmatmul.msk.f32.gmra.mxu2 %vm676_vm2, %v639_v47  ;;  %1711 = vmatmul.msk.f32.gmra.mxu3 %vm676_vm2, %v639_v47  ;;  %v671_v3 = vpop.trf.xlu1 }
 0x1db   : > { %v640_v49 = vpop.trf.xlu0 }
 0x1dc   : > { %1679 = vmatmul.msk.f32.gmra.mxu2 %vm676_vm2, %v640_v49  ;;  %1712 = vmatmul.msk.f32.gmra.mxu3 %vm676_vm2, %v640_v49  ;;  %v672_v6 = vpop.trf.xlu1 }
 0x1e3   : > { %v641_v50 = vpop.trf.xlu0 }
 0x1e4   : > { %1680 = vmatmul.msk.f32.gmra.mxu2 %vm676_vm2, %v641_v50  ;;  %1713 = vmatmul.msk.f32.gmra.mxu3 %vm676_vm2, %v641_v50  ;;  %v673_v10 = vpop.trf.xlu1 }
 0x1eb   : > { %v642_v52 = vpop.trf.xlu0 }
 0x1ec   : > { %1681 = vmatmul.msk.f32.gmra.mxu2 %vm676_vm2, %v642_v52  ;;  %1714 = vmatmul.msk.f32.gmra.mxu3 %vm676_vm2, %v642_v52  ;;  %v674_v14 = vpop.trf.xlu1 }
 0x1f3   : > { %v643_v54 = vpop.trf.xlu0 }
 0x1f4   : > { %1682 = vmatmul.msk.f32.gmra.mxu2 %vm676_vm2, %v643_v54  ;;  %1715 = vmatmul.msk.f32.gmra.mxu3 %vm676_vm2, %v643_v54  ;;  %v675_v21 = vpop.trf.xlu1 }
 0x1f9   : > { %v2436_v29 = vpop.f32.mrf.mxu0  ;;  %v2450_v36 = vpop.f32.mrf.mxu1 }
 0x1fc   : > { %1683 = vmatmul.msk.f32.gmra.mxu2 %vm676_vm2, %v660_v48  ;;  %1716 = vmatmul.msk.f32.gmra.mxu3 %vm676_vm2, %v660_v48 }
 0x201   : > { %v2444_v33 = vpop.f32.mrf.mxu0  ;;  %v2462_v42 = vpop.f32.mrf.mxu1 }
 0x202   : > { %3058 = vst [vmem:[#allocation29_spill] sm:$0xff] %v2462_v42 }
 0x204   : > { %1684 = vmatmul.msk.f32.gmra.mxu2 %vm676_vm2, %v661_v51  ;;  %1717 = vmatmul.msk.f32.gmra.mxu3 %vm676_vm2, %v661_v51 }
 0x209   : > { %v2456_v39 = vpop.f32.mrf.mxu0  ;;  %v2470_v46 = vpop.f32.mrf.mxu1 }
 0x20a   : > { %3060 = vst [vmem:[#allocation31_spill] sm:$0xff] %v2470_v46 }
 0x20c   : > { %1685 = vmatmul.msk.f32.gmra.mxu2 %vm676_vm2, %v662_v53  ;;  %1718 = vmatmul.msk.f32.gmra.mxu3 %vm676_vm2, %v662_v53 }
 0x211   : > { %v2464_v43 = vpop.f32.mrf.mxu0  ;;  %v2478_v50 = vpop.f32.mrf.mxu1 }
 0x212   : > { %3059 = vst [vmem:[#allocation30_spill] sm:$0xff] %v2464_v43 }
 0x213   : > { %3062 = vst [vmem:[#allocation33_spill] sm:$0xff] %v2478_v50 }
 0x214   : > { %1686 = vmatmul.msk.f32.gmra.mxu2 %vm676_vm2, %v663_v55  ;;  %1719 = vmatmul.msk.f32.gmra.mxu3 %vm676_vm2, %v663_v55 }
 0x219   : > { %v2472_v47 = vpop.f32.mrf.mxu0  ;;  %v2486_v54 = vpop.f32.mrf.mxu1 }
 0x21a   : > { %3061 = vst [vmem:[#allocation32_spill] sm:$0xff] %v2472_v47 }
 0x21c   : > { %1687 = vmatmul.msk.f32.gmra.mxu2 %vm676_vm2, %v664_v57  ;;  %1720 = vmatmul.msk.f32.gmra.mxu3 %vm676_vm2, %v664_v57 }
 0x221   : > { %v2480_v51 = vpop.f32.mrf.mxu0 }
 0x222   : > { %3063 = vst [vmem:[#allocation34_spill] sm:$0xff] %v2480_v51 }
 0x224   : > { %1688 = vmatmul.msk.f32.gmra.mxu2 %vm676_vm2, %v665_v59  ;;  %1721 = vmatmul.msk.f32.gmra.mxu3 %vm676_vm2, %v665_v59  ;;  %v2496_v59 = vpop.f32.mrf.mxu1 }
 0x225   : > { %3065 = vst [vmem:[#allocation36_spill] sm:$0xff] %v2496_v59 }
 0x229   : > { %v2490_v56 = vpop.f32.mrf.mxu0 }
 0x22c   : > { %1689 = vmatmul.msk.f32.gmra.mxu2 %vm676_vm2, %v666_v62  ;;  %1722 = vmatmul.msk.f32.gmra.mxu3 %vm676_vm2, %v666_v62 }
 0x231   : > { %v2498_v60 = vpop.f32.mrf.mxu0 }
 0x232   : > { %3066 = vst [vmem:[#allocation37_spill] sm:$0xff] %v2498_v60 }
 0x234   : > { %1690 = vmatmul.msk.f32.gmra.mxu2 %vm676_vm2, %v667_v63  ;;  %1723 = vmatmul.msk.f32.gmra.mxu3 %vm676_vm2, %v667_v63  ;;  %v2504_v63 = vpop.f32.mrf.mxu1 }
 0x23c   : > { %1691 = vmatmul.msk.f32.gmra.mxu2 %vm676_vm2, %v668_v0  ;;  %1724 = vmatmul.msk.f32.gmra.mxu3 %vm676_vm2, %v668_v0  ;;  %v2506_v0 = vpop.f32.mrf.mxu0 }
 0x244   : > { %1692 = vmatmul.msk.f32.gmra.mxu2 %vm676_vm2, %v669_v1  ;;  %1725 = vmatmul.msk.f32.gmra.mxu3 %vm676_vm2, %v669_v1  ;;  %v2520_v32 = vpop.f32.mrf.mxu0 }
 0x24c   : > { %1693 = vmatmul.msk.f32.gmra.mxu2 %vm676_vm2, %v670_v2  ;;  %1726 = vmatmul.msk.f32.gmra.mxu3 %vm676_vm2, %v670_v2 }
 0x24f   : > { %v2384_v4 = vpop.f32.mrf.mxu2  ;;  %v2386_v5 = vpop.f32.mrf.mxu3 }
 0x254   : > { %1694 = vmatmul.msk.f32.gmra.mxu2 %vm676_vm2, %v671_v3  ;;  %1727 = vmatmul.msk.f32.gmra.mxu3 %vm676_vm2, %v671_v3  ;;  %v1006_v3 = vmax.f32 %v2436_v29, %v2456_v39 }
 0x257   : > { %v2390_v7 = vpop.f32.mrf.mxu2  ;;  %v2392_v8 = vpop.f32.mrf.mxu3 }
 0x258   : > { %3046 = vst [vmem:[#allocation17_spill] sm:$0xff] %v2392_v8 }
 0x25c   : > { %1695 = vmatmul.msk.f32.gmra.mxu2 %vm676_vm2, %v672_v6  ;;  %1728 = vmatmul.msk.f32.gmra.mxu3 %vm676_vm2, %v672_v6  ;;  %v1007_v6 = vmax.f32 %v2444_v33, %v2464_v43 }
 0x25f   : > { %v2398_v11 = vpop.f32.mrf.mxu2  ;;  %v2400_v12 = vpop.f32.mrf.mxu3 }
 0x260   : > { %3048 = vst [vmem:[#allocation19_spill] sm:$0xff] %v2398_v11 }
 0x261   : > { %3049 = vst [vmem:[#allocation20_spill] sm:$0xff] %v2400_v12 }
 0x264   : > { %1696 = vmatmul.msk.f32.gmra.mxu2 %vm676_vm2, %v673_v10  ;;  %1729 = vmatmul.msk.f32.gmra.mxu3 %vm676_vm2, %v673_v10  ;;  %v2516_v10 = vpop.f32.mrf.mxu1 }
 0x265   : > { %3068 = vst [vmem:[#allocation39_spill] sm:$0xff] %v2516_v10 }
 0x267   : > { %v2406_v15 = vpop.f32.mrf.mxu2  ;;  %v2408_v16 = vpop.f32.mrf.mxu3 }
 0x26c   : > { %1697 = vmatmul.msk.f32.gmra.mxu2 %vm676_vm2, %v674_v14  ;;  %1730 = vmatmul.msk.f32.gmra.mxu3 %vm676_vm2, %v674_v14  ;;  %v1008_v14 = vmax.f32 %v1006_v3, %v2472_v47  ;;  %v2534_v47 = vpop.f32.mrf.mxu1 }
 0x26d   : > { %3069 = vst [vmem:[#allocation40_spill] sm:$0xff] %v2534_v47 }
 0x26e   : > { %v1010_v24 = vmax.f32 %v1008_v14, %v2490_v56 }
 0x26f   : > { %v2414_v18 = vpop.f32.mrf.mxu2  ;;  %v2416_v19 = vpop.f32.mrf.mxu3 }
 0x270   : > { %v1012_v13 = vmax.f32 %v1010_v24, %v2506_v0  ;;  %v1044_v24 = vmax.f32 %v2462_v42, %v2478_v50 }
 0x272   : > { %v1014_v9 = vmax.f32 %v1012_v13, %v2384_v4 }
 0x274   : > { %1698 = vmatmul.msk.f32.gmra.mxu2 %vm676_vm2, %v675_v21  ;;  %1731 = vmatmul.msk.f32.gmra.mxu3 %vm676_vm2, %v675_v21  ;;  %v1009_v21 = vmax.f32 %v1007_v6, %v2480_v51  ;;  %v1016_v6 = vmax.f32 %v1014_v9, %v2398_v11 }
 0x276   : > { %v1011_v20 = vmax.f32 %v1009_v21, %v2498_v60  ;;  %v1018_v14 = vmax.f32 %v1016_v6, %v2414_v18 }
 0x277   : > { %v2422_v22 = vpop.f32.mrf.mxu2  ;;  %v2424_v23 = vpop.f32.mrf.mxu3 }
 0x278   : > { %v1013_v17 = vmax.f32 %v1011_v20, %v2520_v32 }
 0x27a   : > { %v1015_v3 = vmax.f32 %v1013_v17, %v2390_v7 }
 0x27c   : > { %v1017_v51 = vmax.f32 %v1015_v3, %v2406_v15 }
 0x27e   : > { %v1019_v21 = vmax.f32 %v1017_v51, %v2422_v22  ;;  %v1043_v51 = vmax.f32 %v2450_v36, %v2470_v46 }
 0x27f   : > { %v2430_v26 = vpop.f32.mrf.mxu2  ;;  %v2432_v27 = vpop.f32.mrf.mxu3 }
 0x280   : > { %v1020_v20 = vmax.f32 %v1018_v14, %v2430_v26  ;;  %v1046_v14 = vmax.f32 %v1044_v24, %v2496_v59 }
 0x282   : > { %v1048_v50 = vmax.f32 %v1046_v14, %v2516_v10 }
 0x287   : > { %v2438_v30 = vpop.f32.mrf.mxu2  ;;  %v2440_v31 = vpop.f32.mrf.mxu3 }
 0x288   : > { %v1021_v13 = vmax.f32 %v1019_v21, %v2438_v30 }
 0x28f   : > { %v2446_v34 = vpop.f32.mrf.mxu2  ;;  %v2448_v35 = vpop.f32.mrf.mxu3 }
 0x290   : > { %3057 = vst [vmem:[#allocation28_spill] sm:$0xff] %v2446_v34  ;;  %v1022_v17 = vmax.f32 %v1020_v20, %v2446_v34  ;;  %v2557_v34 = vpop.f32.mrf.mxu1 }
 0x291   : > { %3070 = vst [vmem:[#allocation41_spill] sm:$0xff] %v2557_v34  ;;  %v1050_v24 = vmax.f32 %v1048_v50, %v2557_v34  ;;  %v1802_v34 = vld [vmem:[#allocation2] ss:$0 sm:$0xff] }
 0x292   : > { %1502 = vperm.xlu2 %1801, %v1802_v34  }
 0x297   : > { %v2452_v37 = vpop.f32.mrf.mxu2  ;;  %v2454_v38 = vpop.f32.mrf.mxu3 }
 0x298   : > { %v1023_v9 = vmax.f32 %v1021_v13, %v2452_v37  ;;  %v1045_v13 = vmax.f32 %v1043_v51, %v2486_v54  ;;  %v1052_v51 = vmax.f32 %v1050_v24, %v2392_v8 }
 0x29a   : > { %v1047_v46 = vmax.f32 %v1045_v13, %v2504_v63  ;;  %v1054_v13 = vmax.f32 %v1052_v51, %v2408_v16 }
 0x29c   : > { %v1049_v59 = vmax.f32 %v1047_v46, %v2534_v47  ;;  %v1056_v46 = vmax.f32 %v1054_v13, %v2424_v23 }
 0x29f   : > { %v2458_v40 = vpop.f32.mrf.mxu2  ;;  %v2460_v41 = vpop.f32.mrf.mxu3 }
 0x2a0   : > { %v1024_v3 = vmax.f32 %v1022_v17, %v2458_v40 }
 0x2a7   : > { %v2466_v44 = vpop.f32.mrf.mxu2  ;;  %v2468_v45 = vpop.f32.mrf.mxu3 }
 0x2a8   : > { %v1025_v11 = vmax.f32 %v1023_v9, %v2466_v44 }
 0x2af   : > { %v2474_v48 = vpop.f32.mrf.mxu2  ;;  %v2476_v49 = vpop.f32.mrf.mxu3 }
 0x2b0   : > { %v1026_v21 = vmax.f32 %v1024_v3, %v2474_v48 }
 0x2b7   : > { %v2482_v52 = vpop.f32.mrf.mxu2  ;;  %v2484_v53 = vpop.f32.mrf.mxu3 }
 0x2b8   : > { %v1027_v20 = vmax.f32 %v1025_v11, %v2482_v52 }
 0x2bf   : > { %v2488_v55 = vpop.f32.mrf.mxu2  ;;  %v2492_v57 = vpop.f32.mrf.mxu3 }
 0x2c0   : > { %3064 = vst [vmem:[#allocation35_spill] sm:$0xff] %v2492_v57  ;;  %v1028_v17 = vmax.f32 %v1026_v21, %v2488_v55 }
 0x2c7   : > { %v2494_v58 = vpop.f32.mrf.mxu2  ;;  %v2500_v61 = vpop.f32.mrf.mxu3 }
 0x2c8   : > { %3067 = vst [vmem:[#allocation38_spill] sm:$0xff] %v2500_v61  ;;  %v1029_v9 = vmax.f32 %v1027_v20, %v2494_v58  ;;  %v1051_v20 = vmax.f32 %v1049_v59, %v2386_v5 }
 0x2cf   : > { %v2502_v62 = vpop.f32.mrf.mxu2  ;;  %v2508_v1 = vpop.f32.mrf.mxu3 }
 0x2d0   : > { %v1030_v3 = vmax.f32 %v1028_v17, %v2502_v62 }
 0x2d7   : > { %v2510_v2 = vpop.f32.mrf.mxu2  ;;  %v2522_v28 = vpop.f32.mrf.mxu3 }
 0x2d8   : > { %v1031_v11 = vmax.f32 %v1029_v9, %v2510_v2  ;;  %v1053_v9 = vmax.f32 %v1051_v20, %v2400_v12 }
 0x2df   : > { %v2524_v25 = vpop.f32.mrf.mxu2  ;;  %v2540_v60 = vpop.f32.mrf.mxu3 }
 0x2e0   : > { %v1032_v14 = vmax.f32 %v1030_v3, %v2524_v25  ;;  %v1055_v3 = vmax.f32 %v1053_v9, %v2416_v19 }
 0x2e2   : > { %v1057_v59 = vmax.f32 %v1055_v3, %v2432_v27 }
 0x2e7   : > { %v2536_v43 = vpop.f32.mrf.mxu2  ;;  %v2563_v42 = vpop.f32.mrf.mxu3 }
 0x2e8   : > { %v1033_v21 = vmax.f32 %v1031_v11, %v2536_v43  ;;  %v1058_v11 = vmax.f32 %v1056_v46, %v2440_v31 }
 0x2ea   : > { %v1060_v51 = vmax.f32 %v1058_v11, %v2454_v38 }
 0x2ec   : > { %v1062_v20 = vmax.f32 %v1060_v51, %v2468_v45 }
 0x2ee   : > { %v1064_v34 = vmax.f32 %v1062_v20, %v2484_v53 }
 0x2ef   : > { %v2550_v6 = vpop.f32.mrf.mxu2  ;;  %v2583_v47 = vpop.f32.mrf.mxu3 }
 0x2f0   : > { %v1034_v50 = vmax.f32 %v1032_v14, %v2550_v6  ;;  %v1066_v9 = vmax.f32 %v1064_v34, %v2500_v61 }
 0x2f2   : > { %v1068_v11 = vmax.f32 %v1066_v9, %v2522_v28  ;;  %v3071_v9 = vld [vmem:[#allocation30_spill] sm:$0xff] }
 0x2f7   : > { %v2573_v10 = vpop.f32.mrf.mxu2 }
 0x2f8   : > { %v1035_v17 = vmax.f32 %v1033_v21, %v2573_v10  ;;  %v1059_v21 = vmax.f32 %v1057_v59, %v2448_v35  ;;  %v1070_v59 = vmax.f32 %v1068_v11, %v2563_v42  ;;  %v3072_v11 = vld [vmem:[#allocation32_spill] sm:$0xff] }
 0x2fa   : > { %v1036_v24 = vmax.f32 %v1034_v50, %v1035_v17  ;;  %v1061_v13 = vmax.f32 %v1059_v21, %v2460_v41 }
 0x2fc   : > { %v1037_v8 = vrot.slane %v1036_v24, 4  ;;  %v1063_v17 = vmax.f32 %v1061_v13, %v2476_v49 }
 0x2fe   : > { %v1038_v14 = vmax.f32 %v1036_v24, %v1037_v8  ;;  %v1065_v3 = vmax.f32 %v1063_v17, %v2492_v57  ;;  %v2595_v8 = vpop.f32.mrf.mxu3 }
 0x300   : > { %v1039_v12 = vrot.slane %v1038_v14, 2  ;;  %v1067_v24 = vmax.f32 %v1065_v3, %v2508_v1 }
 0x302   : > { %v1040_v50 = vmax.f32 %v1038_v14, %v1039_v12  ;;  %v1069_v21 = vmax.f32 %v1067_v24, %v2540_v60  ;;  %v1072_v12 = vmax.f32 %v1070_v59, %v2595_v8 }
 0x304   : > { %v1041_v46 = vrot.slane %v1040_v50, 1  ;;  %v1071_v14 = vmax.f32 %v1069_v21, %v2583_v47 }
 0x306   : > { %v2599_v51 = vmax.f32 %v1040_v50, %v1041_v46  ;;  %v1073_v17 = vmax.f32 %v1071_v14, %v1072_v12 }
 0x308   : > { %v1080_v20 = vsub.f32 %v2436_v29, %v2599_v51  ;;  %v1082_v13 = vsub.f32 %v2444_v33, %v2599_v51  ;;  %v1084_v34 = vsub.f32 %v2456_v39, %v2599_v51  ;;  %v1086_v50 = vsub.f32 %v3071_v9, %v2599_v51  ;;  %v3073_v29 = vld [vmem:[#allocation34_spill] sm:$0xff] }
 0x309   : > { %v1088_v24 = vsub.f32 %v3072_v11, %v2599_v51  ;;  %v1074_v21 = vrot.slane %v1073_v17, 4  ;;  %v1090_v57 = vsub.f32 %v3073_v29, %v2599_v51  ;;  %v1092_v39 = vsub.f32 %v2490_v56, %v2599_v51 }
 0x30a   : > { %v1144_v46 = vmul.f32 1.442695, %v1080_v20  ;;  %v1148_v3 = vmul.f32 1.442695, %v1082_v13  ;;  %v1152_v59 = vmul.f32 1.442695, %v1084_v34  ;;  %v1096_v34 = vsub.f32 %v2506_v0, %v2599_v51 }
 0x30b   : > { %v1156_v33 = vmul.f32 1.442695, %v1086_v50  ;;  %v1160_v12 = vmul.f32 1.442695, %v1088_v24  ;;  %v1075_v14 = vmax.f32 %v1073_v17, %v1074_v21  ;;  %v3074_v20 = vld [vmem:[#allocation37_spill] sm:$0xff]  ;;  %v1110_v50 = vsub.f32 %v2422_v22, %v2599_v51 }
 0x30c   : > { %1803 = vpow2.f32 %v1144_v46  ;;  %v1094_v13 = vsub.f32 %v3074_v20, %v2599_v51  ;;  %v1164_v9 = vmul.f32 1.442695, %v1090_v57  ;;  %v1168_v56 = vmul.f32 1.442695, %v1092_v39 }
 0x30d   : > { %1805 = vpow2.f32 %v1148_v3  ;;  %v1098_v17 = vsub.f32 %v2520_v32, %v2599_v51  ;;  %v1076_v24 = vrot.slane %v1075_v14, 2  ;;  %v1100_v21 = vsub.f32 %v2384_v4, %v2599_v51  ;;  %v3075_v4 = vld [vmem:[#allocation19_spill] sm:$0xff] }
 0x30e   : > { %1807 = vpow2.f32 %v1152_v59  ;;  %v1108_v59 = vsub.f32 %v2414_v18, %v2599_v51  ;;  %v1172_v0 = vmul.f32 1.442695, %v1094_v13  ;;  %v1176_v22 = vmul.f32 1.442695, %v1096_v34 }
 0x30f   : > { %1809 = vpow2.f32 %v1156_v33  ;;  %v1106_v32 = vsub.f32 %v2406_v15, %v2599_v51  ;;  %v1204_v39 = vmul.f32 1.442695, %v1110_v50  ;;  %v1180_v20 = vmul.f32 1.442695, %v1098_v17 }
 0x310   : > { %1811 = vpow2.f32 %v1160_v12  ;;  %v1102_v12 = vsub.f32 %v2390_v7, %v2599_v51  ;;  %v1077_v13 = vmax.f32 %v1075_v14, %v1076_v24  ;;  %v1104_v34 = vsub.f32 %v3075_v4, %v2599_v51  ;;  %v3076_v14 = vld [vmem:[#allocation28_spill] sm:$0xff] }
 0x311   : > { %1813 = vpow2.f32 %v1164_v9  ;;  %v1112_v61 = vsub.f32 %v2430_v26, %v2599_v51  ;;  %v1184_v15 = vmul.f32 1.442695, %v1100_v21  ;;  %v1114_v7 = vsub.f32 %v2438_v30, %v2599_v51 }
 0x312   : > { %v2620_v11 = vpop.eup %1803  ;;  %1815 = vpow2.f32 %v1168_v56  ;;  %v1116_v17 = vsub.f32 %v3076_v14, %v2599_v51  ;;  %v1196_v24 = vmul.f32 1.442695, %v1106_v32  ;;  %v1118_v21 = vsub.f32 %v2452_v37, %v2599_v51 }
 0x313   : > { %v2624_v46 = vpop.eup %1805  ;;  %1817 = vpow2.f32 %v1172_v0  ;;  %v1188_v0 = vmul.f32 1.442695, %v1102_v12  ;;  %v1120_v30 = vsub.f32 %v2458_v40, %v2599_v51  ;;  %v1122_v12 = vsub.f32 %v2466_v44, %v2599_v51 }
 0x314   : > { %v1272_v3 = vadd.f32 %v2624_v46, %v2620_v11  ;;  %v2632_v57 = vpop.eup %1807  ;;  %1819 = vpow2.f32 %v1176_v22  ;;  %v1192_v22 = vmul.f32 1.442695, %v1104_v34  ;;  %v1212_v4 = vmul.f32 1.442695, %v1114_v7 }
 0x315   : > { %v2639_v33 = vpop.eup %1809  ;;  %1821 = vpow2.f32 %v1204_v39  ;;  %v1216_v34 = vmul.f32 1.442695, %v1116_v17  ;;  %v1220_v44 = vmul.f32 1.442695, %v1118_v21  ;;  %v1224_v7 = vmul.f32 1.442695, %v1120_v30 }
 0x316   : > { %v1273_v29 = vadd.f32 %v2632_v57, %v1272_v3  ;;  %v2646_v9 = vpop.eup %1811  ;;  %v1200_v3 = vmul.f32 1.442695, %v1108_v59  ;;  %1823 = vpow2.f32 %v1180_v20  ;;  %v1124_v20 = vsub.f32 %v2474_v48, %v2599_v51 }
 0x317   : > { %v2653_v56 = vpop.eup %1813  ;;  %v1140_v48 = vsub.f32 %v2550_v6, %v2599_v51  ;;  %v1142_v17 = vsub.f32 %v2573_v10, %v2599_v51  ;;  %v1138_v10 = vsub.f32 %v2536_v43, %v2599_v51 }
 0x318   : > { %v1274_v18 = vadd.f32 %v2639_v33, %v1273_v29  ;;  %v1078_v29 = vrot.slane %v1077_v13, 1  ;;  %v2660_v26 = vpop.eup %1815  ;;  %1825 = vpow2.f32 %v1200_v3 }
 0x319   : > { %1827 = vpow2.f32 %v1184_v15  ;;  %v2667_v39 = vpop.eup %1817  ;;  %v1126_v15 = vsub.f32 %v2482_v52, %v2599_v51 }
 0x31a   : > { %v1275_v50 = vadd.f32 %v2646_v9, %v1274_v18  ;;  %v1208_v18 = vmul.f32 1.442695, %v1112_v61  ;;  %1829 = vpow2.f32 %v1196_v24  ;;  %v2673_v37 = vpop.eup %1819  ;;  %v2676_v3 = vmax.f32 %v1077_v13, %v1078_v29 }
 0x31b   : > { %1831 = vpow2.f32 %v1188_v0  ;;  %v2678_v61 = vpop.eup %1821  ;;  %v1228_v24 = vmul.f32 1.442695, %v1122_v12  ;;  %v1232_v0 = vmul.f32 1.442695, %v1124_v20  ;;  %v1236_v21 = vmul.f32 1.442695, %v1126_v15 }
 0x31c   : > { %v1276_v59 = vadd.f32 %v2653_v56, %v1275_v50  ;;  %1833 = vpow2.f32 %v1192_v22  ;;  %v2682_v50 = vpop.eup %1823  ;;  %1346 = vmatpush.msrb.mxu0 %v2678_v61  ;;  %v1081_v6 = vsub.f32 %v2450_v36, %v2676_v3  ;;  %v3077_v22 = vld [vmem:[#allocation29_spill] sm:$0xff]  ;;  %v3078_v36 = vld [vmem:[#allocation31_spill] sm:$0xff]  ;;  %v1136_v15 = vsub.f32 %v2524_v25, %v2599_v51 }
 0x31d   : > { %1835 = vpow2.f32 %v1208_v18  ;;  %v1083_v30 = vsub.f32 %v3077_v22, %v2676_v3  ;;  %v1260_v22 = vmul.f32 1.442695, %v1138_v10 }
 0x31e   : > { %v1277_v32 = vadd.f32 %v2660_v26, %v1276_v59  ;;  %v1826_v13 = vpop.eup %1825  ;;  %1837 = vpow2.f32 %v1212_v4  ;;  %v1268_v4 = vmul.f32 1.442695, %v1142_v17 }
 0x31f   : > { %v1828_v52 = vpop.eup %1827  ;;  %1839 = vpow2.f32 %v1216_v34  ;;  %1347 = vmatpush.msrb.mxu0 %v1826_v13  ;;  %v1085_v34 = vsub.f32 %v3078_v36, %v2676_v3 }
 0x320   : > { %v1278_v40 = vadd.f32 %v2667_v39, %v1277_v32  ;;  %v1830_v29 = vpop.eup %1829  ;;  %1841 = vpow2.f32 %v1220_v44  ;;  %v1264_v32 = vmul.f32 1.442695, %v1140_v48  ;;  %v3079_v48 = vld [vmem:[#allocation33_spill] sm:$0xff] }
 0x321   : > { %v1832_v18 = vpop.eup %1831  ;;  %1843 = vpow2.f32 %v1224_v7  ;;  %1348 = vmatpush.msrb.mxu0 %v1830_v29  ;;  %v1087_v7 = vsub.f32 %v3079_v48, %v2676_v3 }
 0x322   : > { %v1279_v14 = vadd.f32 %v2673_v37, %v1278_v40  ;;  %v1834_v20 = vpop.eup %1833  ;;  %1845 = vpow2.f32 %v1228_v24  ;;  %v1150_v24 = vmul.f32 1.442695, %v1083_v30  ;;  %v1132_v30 = vsub.f32 %v2502_v62, %v2599_v51 }
 0x323   : > { %v2699_v40 = vpop.eup %1835  ;;  %1847 = vpow2.f32 %v1232_v0  ;;  %1349 = vmatpush.msrb.mxu0 %v1834_v20  ;;  %v1089_v0 = vsub.f32 %v2486_v54, %v2676_v3  ;;  %v1130_v54 = vsub.f32 %v2494_v58, %v2599_v51 }
 0x324   : > { %v1280_v59 = vadd.f32 %v2682_v50, %v1279_v14  ;;  %v1146_v14 = vmul.f32 1.442695, %v1081_v6  ;;  %v2703_v43 = vpop.eup %1837  ;;  %1849 = vpow2.f32 %v1236_v21  ;;  %v1154_v6 = vmul.f32 1.442695, %v1085_v34 }
 0x325   : > { %v2707_v17 = vpop.eup %1839  ;;  %1851 = vpow2.f32 %v1264_v32  ;;  %1350 = vmatpush.msrb.mxu0 %v1832_v18  ;;  %v1158_v32 = vmul.f32 1.442695, %v1087_v7 }
 0x326   : > { %v1281_v12 = vadd.f32 %v1828_v52, %v1280_v59  ;;  %v1134_v59 = vsub.f32 %v2510_v2, %v2599_v51  ;;  %v2711_v25 = vpop.eup %1841  ;;  %1853 = vpow2.f32 %v1268_v4 }
 0x327   : > { %v2715_v21 = vpop.eup %1843  ;;  %1855 = vpow2.f32 %v1146_v14  ;;  %1351 = vmatpush.msrb.mxu0 %v1828_v52  ;;  %v1128_v52 = vsub.f32 %v2488_v55, %v2599_v51  ;;  %v1248_v14 = vmul.f32 1.442695, %v1132_v30 }
 0x328   : > { %v1282_v44 = vadd.f32 %v1832_v18, %v1281_v12  ;;  %v1256_v12 = vmul.f32 1.442695, %v1136_v15  ;;  %v2719_v2 = vpop.eup %1845  ;;  %v3080_v18 = vld [vmem:[#allocation36_spill] sm:$0xff]  ;;  %1857 = vpow2.f32 %v1150_v24  ;;  %v1252_v4 = vmul.f32 1.442695, %v1134_v59 }
 0x329   : > { %v1091_v10 = vsub.f32 %v3080_v18, %v2676_v3  ;;  %1859 = vpow2.f32 %v1260_v22  ;;  %1352 = vmatpush.msrb.mxu0 %v2682_v50  ;;  %v1162_v15 = vmul.f32 1.442695, %v1089_v0  ;;  %v3081_v50 = vld [vmem:[#allocation39_spill] sm:$0xff]  ;;  %v1244_v24 = vmul.f32 1.442695, %v1130_v54  ;;  %v3082_v22 = vld [vmem:[#allocation40_spill] sm:$0xff] }
 0x32a   : > { %v1283_v36 = vadd.f32 %v1834_v20, %v1282_v44  ;;  %v2723_v20 = vpop.eup %1847  ;;  %1861 = vpow2.f32 %v1154_v6  ;;  %v1095_v7 = vsub.f32 %v3081_v50, %v2676_v3  ;;  %v1111_v0 = vsub.f32 %v2424_v23, %v2676_v3 }
 0x32b   : > { %v2728_v62 = vpop.eup %1849  ;;  %1863 = vpow2.f32 %v1256_v12  ;;  %1353 = vmatpush.msrb.mxu0 %v2673_v37  ;;  %v1166_v55 = vmul.f32 1.442695, %v1091_v10  ;;  %v1101_v23 = vsub.f32 %v2386_v5, %v2676_v3  ;;  %v3084_v5 = vld [vmem:[#allocation17_spill] sm:$0xff] }
 0x32c   : > { %v1284_v48 = vadd.f32 %v1830_v29, %v1283_v36  ;;  %v1093_v29 = vsub.f32 %v2504_v63, %v2676_v3  ;;  %v2734_v44 = vpop.eup %1851  ;;  %1865 = vpow2.f32 %v1158_v32  ;;  %v2744_v63 = vpop.permute.xlu2 %524  ;;  %v1240_v36 = vmul.f32 1.442695, %v1128_v52 }
 0x32d   : > { %1867 = vpow2.f32 %v1252_v4  ;;  %1354 = vmatpush.msrb.mxu0 %v2667_v39  ;;  %v1109_v32 = vsub.f32 %v2416_v19, %v2676_v3  ;;  %v1174_v54 = vmul.f32 1.442695, %v1095_v7  ;;  %v1107_v19 = vsub.f32 %v2408_v16, %v2676_v3 }
 0x32e   : > { %v1285_v34 = vadd.f32 %v1826_v13, %v1284_v48  ;;  %v2738_v13 = vpop.eup %1853  ;;  %1869 = vpow2.f32 %v1162_v15  ;;  %v1170_v6 = vmul.f32 1.442695, %v1093_v29  ;;  %v3083_v48 = vld [vmem:[#allocation41_spill] sm:$0xff]  ;;  %v1103_v15 = vsub.f32 %v3084_v5, %v2676_v3  ;;  %v3086_v5 = vld [vmem:[#allocation18_spill] sm:$0xff] }
 0x32f   : > { %v2742_v51 = vpop.eup %1855  ;;  %1375 = vmatpush.msrb.mxu1 %v2738_v13  ;;  %1871 = vpow2.f32 %v1248_v14  ;;  %v1099_v18 = vsub.f32 %v3083_v48, %v2676_v3  ;;  %1355 = vmatpush.msrb.mxu0 %v2660_v26  ;;  %v1206_v14 = vmul.f32 1.442695, %v1111_v0  ;;  %v1202_v16 = vmul.f32 1.442695, %v1109_v32 }
 0x330   : > { %v1286_v58 = vadd.f32 %v2678_v61, %v1285_v34  ;;  %v1097_v61 = vsub.f32 %v3082_v22, %v2676_v3  ;;  %v2751_v37 = vpop.eup %1857  ;;  %1873 = vpow2.f32 %v1166_v55 }
 0x331   : > { %v2755_v30 = vpop.eup %1859  ;;  %v1309_v10 = vadd.f32 %v2751_v37, %v2742_v51  ;;  %1376 = vmatpush.msrb.mxu1 %v2734_v44  ;;  %1875 = vpow2.f32 %v1244_v24  ;;  %1356 = vmatpush.msrb.mxu0 %v2653_v56  ;;  %v1182_v7 = vmul.f32 1.442695, %v1099_v18  ;;  %v3085_v24 = vld [vmem:[#allocation20_spill] sm:$0xff] }
 0x332   : > { %v1287_v59 = vadd.f32 %v2699_v40, %v1286_v58  ;;  %v2764_v39 = vpop.eup %1861  ;;  %v1178_v52 = vmul.f32 1.442695, %v1097_v61  ;;  %1877 = vpow2.f32 %v1170_v6 }
 0x333   : > { %v2770_v4 = vpop.eup %1863  ;;  %v1310_v29 = vadd.f32 %v2764_v39, %v1309_v10  ;;  %1377 = vmatpush.msrb.mxu1 %v2755_v30  ;;  %1879 = vpow2.f32 %v1240_v36  ;;  %1357 = vmatpush.msrb.mxu0 %v2646_v9  ;;  %v1186_v36 = vmul.f32 1.442695, %v1101_v23  ;;  %v1198_v9 = vmul.f32 1.442695, %v1107_v19 }
 0x334   : > { %v1288_v12 = vadd.f32 %v2703_v43, %v1287_v59  ;;  %v2776_v26 = vpop.eup %1865  ;;  %v1105_v59 = vsub.f32 %v3085_v24, %v2676_v3  ;;  %1881 = vpow2.f32 %v1174_v54  ;;  %v2798_v48 = vpop.permute.xlu2 %529  ;;  %v1190_v10 = vmul.f32 1.442695, %v1103_v15 }
 0x335   : > { %v2782_v58 = vpop.eup %1867  ;;  %v1311_v55 = vadd.f32 %v2776_v26, %v1310_v29  ;;  %1378 = vmatpush.msrb.mxu1 %v2770_v4  ;;  %1883 = vpow2.f32 %v1178_v52  ;;  %1358 = vmatpush.msrb.mxu0 %v2639_v33  ;;  %v2812_v15 = vadd.f32 %v3086_v5, %v2744_v63 }
 0x336   : > { %v1289_v34 = vadd.f32 %v2707_v17, %v1288_v12  ;;  %v2788_v56 = vpop.eup %1869  ;;  %1885 = vpow2.f32 %v1206_v14  ;;  %v1194_v54 = vmul.f32 1.442695, %v1105_v59 }
 0x337   : > { %v1872_v22 = vpop.eup %1871  ;;  %v1312_v0 = vadd.f32 %v2788_v56, %v1311_v55  ;;  %1379 = vmatpush.msrb.mxu1 %v2782_v58  ;;  %1887 = vpow2.f32 %v1182_v7  ;;  %1359 = vmatpush.msrb.mxu0 %v2632_v57  ;;  %v1113_v55 = vsub.f32 %v2432_v27, %v2676_v3 }
 0x338   : > { %v1290_v50 = vadd.f32 %v2711_v25, %v1289_v34  ;;  %v2796_v6 = vpop.eup %1873  ;;  %1889 = vpow2.f32 %v1202_v16 }
 0x339   : > { %v1876_v12 = vpop.eup %1875  ;;  %v1313_v32 = vadd.f32 %v2796_v6, %v1312_v0  ;;  %1380 = vmatpush.msrb.mxu1 %v1872_v22  ;;  %1891 = vpow2.f32 %v1186_v36  ;;  %1360 = vmatpush.msrb.mxu0 %v2624_v46  ;;  %v1115_v36 = vsub.f32 %v2440_v31, %v2676_v3 }
 0x33a   : > { %v1291_v61 = vadd.f32 %v2715_v21, %v1290_v50  ;;  %v2803_v23 = vpop.eup %1877  ;;  %1893 = vpow2.f32 %v1198_v9 }
 0x33b   : > { %v1880_v33 = vpop.eup %1879  ;;  %v1314_v52 = vadd.f32 %v2803_v23, %v1313_v32  ;;  %1381 = vmatpush.msrb.mxu1 %v1876_v12  ;;  %1895 = vpow2.f32 %v1190_v10  ;;  %1361 = vmatpush.msrb.mxu0 %v2620_v11  ;;  %v1143_v11 = vsub.f32 %v2595_v8, %v2676_v3  ;;  %v1117_v8 = vsub.f32 %v2448_v35, %v2676_v3 }
 0x33c   : > { %v1292_v18 = vadd.f32 %v2719_v2, %v1291_v61  ;;  %v2808_v29 = vpop.eup %1881  ;;  %1897 = vpow2.f32 %v1194_v54  ;;  %1362 = vmatmul.f32.vlgmr.msrb.gmra.mxu0 %v2812_v15 }
 0x33d   : > { %v2814_v57 = vpop.eup %1883  ;;  %v1315_v14 = vadd.f32 %v2808_v29, %v1314_v52  ;;  %1382 = vmatpush.msrb.mxu1 %v1880_v33  ;;  %v1119_v52 = vsub.f32 %v2454_v38, %v2676_v3 }
 0x33e   : > { %v1293_v34 = vadd.f32 %v2723_v20, %v1292_v18  ;;  %v2819_v50 = vpop.eup %1885  ;;  %v2837_v18 = vpop.permute.xlu2 %534 }
 0x33f   : > { %v2822_v46 = vpop.eup %1887  ;;  %v1316_v24 = vadd.f32 %v2814_v57, %v1315_v14  ;;  %1383 = vmatpush.msrb.mxu1 %v2728_v62  ;;  %1404 = vmatpush.msra.mxu0 %v2819_v50  ;;  %v3089_v14 = vld [vmem:[#allocation23_spill] sm:$0xff] }
 0x340   : > { %v1294_v19 = vadd.f32 %v2728_v62, %v1293_v34  ;;  %v1890_v59 = vpop.eup %1889  ;;  %v1141_v62 = vsub.f32 %v2583_v47, %v2676_v3  ;;  %v1139_v47 = vsub.f32 %v2563_v42, %v2676_v3  ;;  %v3088_v34 = vld [vmem:[#allocation21_spill] sm:$0xff]  ;;  %v1137_v42 = vsub.f32 %v2540_v60, %v2676_v3 }
 0x341   : > { %v1892_v16 = vpop.eup %1891  ;;  %v1317_v0 = vadd.f32 %v2822_v46, %v1316_v24  ;;  %1384 = vmatpush.msrb.mxu1 %v2723_v20  ;;  %1405 = vmatpush.msra.mxu0 %v1890_v59  ;;  %v3087_v20 = vld [vmem:[#allocation22_spill] sm:$0xff]  ;;  %v1135_v60 = vsub.f32 %v2522_v28, %v2676_v3 }
 0x342   : > { %v1295_v7 = vadd.f32 %v1880_v33, %v1294_v19  ;;  %v1894_v27 = vpop.eup %1893  ;;  %v2844_v54 = vadd.f32 %v3087_v20, %v2744_v63  ;;  %v1270_v33 = vmul.f32 1.442695, %v1143_v11  ;;  %v1121_v63 = vsub.f32 %v2460_v41, %v2676_v3 }
 0x343   : > { %v1896_v9 = vpop.eup %1895  ;;  %v1318_v32 = vadd.f32 %v1892_v16, %v1317_v0  ;;  %1385 = vmatpush.msrb.mxu1 %v2719_v2  ;;  %1406 = vmatpush.msra.mxu0 %v1894_v27  ;;  %v1214_v2 = vmul.f32 1.442695, %v1115_v36  ;;  %v1266_v19 = vmul.f32 1.442695, %v1141_v62  ;;  %v1123_v41 = vsub.f32 %v2468_v45, %v2676_v3 }
 0x344   : > { %v1296_v61 = vadd.f32 %v1876_v12, %v1295_v7  ;;  %v1210_v12 = vmul.f32 1.442695, %v1113_v55  ;;  %v1898_v31 = vpop.eup %1897  ;;  %v1218_v7 = vmul.f32 1.442695, %v1117_v8  ;;  %v1222_v11 = vmul.f32 1.442695, %v1119_v52 }
 0x345   : > { %v1319_v5 = vadd.f32 %v1896_v9, %v1318_v32  ;;  %1386 = vmatpush.msrb.mxu1 %v2715_v21  ;;  %1407 = vmatpush.msra.mxu0 %v1898_v31  ;;  %v1262_v21 = vmul.f32 1.442695, %v1139_v47  ;;  %v1258_v45 = vmul.f32 1.442695, %v1137_v42  ;;  %v1226_v36 = vmul.f32 1.442695, %v1121_v63 }
 0x346   : > { %v1297_v10 = vadd.f32 %v1872_v22, %v1296_v61  ;;  %v2850_v22 = vadd.f32 %v3088_v34, %v2798_v48  ;;  %1899 = vpow2.f32 %v1210_v12 }
 0x347   : > { %v1320_v55 = vadd.f32 %v1898_v31, %v1319_v5  ;;  %1387 = vmatpush.msrb.mxu1 %v2711_v25  ;;  %1408 = vmatpush.msra.mxu0 %v1896_v9  ;;  %1901 = vpow2.f32 %v1270_v33  ;;  %v1125_v25 = vsub.f32 %v2476_v49, %v2676_v3  ;;  %v3092_v33 = vld [vmem:[#allocation24_spill] sm:$0xff] }
 0x348   : > { %v1298_v35 = vadd.f32 %v2782_v58, %v1297_v10  ;;  %1365 = vmatmul.f32.gmra.mxu0 %v2850_v22  ;;  %v2863_v58 = vadd.f32 %v3089_v14, %v2837_v18  ;;  %1903 = vpow2.f32 %v1214_v2  ;;  %v540_v10 = vpop.permute.xlu2 %539  ;;  %v604_v34 = vadd.f32 %v3092_v33, %v2798_v48 }
 0x349   : > { %v1321_v61 = vadd.f32 %v1894_v27, %v1320_v55  ;;  %1388 = vmatpush.msrb.mxu1 %v2707_v17  ;;  %1409 = vmatpush.msra.mxu0 %v1892_v16  ;;  %1905 = vpow2.f32 %v1266_v19  ;;  %v1127_v17 = vsub.f32 %v2484_v53, %v2676_v3  ;;  %v1254_v16 = vmul.f32 1.442695, %v1135_v60  ;;  %v3091_v53 = vld [vmem:[#allocation35_spill] sm:$0xff]  ;;  %v3094_v55 = vld [vmem:[#allocation26_spill] sm:$0xff] }
 0x34a   : > { %v1299_v38 = vadd.f32 %v2770_v4, %v1298_v35  ;;  %v1133_v4 = vsub.f32 %v2508_v1, %v2676_v3  ;;  %1907 = vpow2.f32 %v1218_v7  ;;  %v1234_v9 = vmul.f32 1.442695, %v1125_v25  ;;  %v3093_v35 = vld [vmem:[#allocation25_spill] sm:$0xff] }
 0x34b   : > { %v1322_v0 = vadd.f32 %v1890_v59, %v1321_v61  ;;  %1389 = vmatpush.msrb.mxu1 %v2703_v43  ;;  %1410 = vmatpush.msra.mxu0 %v2822_v46  ;;  %1909 = vpow2.f32 %v1262_v21  ;;  %v1129_v46 = vsub.f32 %v3091_v53, %v2676_v3  ;;  %v1238_v8 = vmul.f32 1.442695, %v1127_v17 }
 0x34c   : > { %v1300_v24 = vadd.f32 %v2755_v30, %v1299_v38  ;;  %v3090_v30 = vld [vmem:[#allocation38_spill] sm:$0xff]  ;;  %v2884_v1 = vpop.eup %1899  ;;  %1911 = vpow2.f32 %v1222_v11  ;;  %v1250_v62 = vmul.f32 1.442695, %v1133_v4  ;;  %v581_v52 = vadd.f32 %v3093_v35, %v540_v10 }
 0x34d   : > { %v1131_v49 = vsub.f32 %v3090_v30, %v2676_v3  ;;  %v1323_v59 = vadd.f32 %v2819_v50, %v1322_v0  ;;  %1390 = vmatpush.msrb.mxu1 %v2699_v40  ;;  %1411 = vmatpush.msra.mxu0 %v2814_v57  ;;  %v2892_v43 = vpop.eup %1901  ;;  %1913 = vpow2.f32 %v1258_v45  ;;  %v1242_v31 = vmul.f32 1.442695, %v1129_v46 }
 0x34e   : > { %v1301_v28 = vadd.f32 %v2734_v44, %v1300_v24  ;;  %v1230_v44 = vmul.f32 1.442695, %v1123_v41  ;;  %1391 = vmatmul.f32.vlgmr.msrb.gmra.mxu1 %v2844_v54  ;;  %1915 = vpow2.f32 %v1226_v36  ;;  %v607_v41 = vadd.f32 %v3094_v55, %v2837_v18  ;;  %v3095_v24 = vld [vmem:[#allocation27_spill] sm:$0xff] }
 0x34f   : > { %v1324_v50 = vadd.f32 %v2884_v1, %v1323_v59  ;;  %1433 = vmatpush.msra.mxu1 %v2892_v43  ;;  %1412 = vmatpush.msra.mxu0 %v2808_v29  ;;  %v1246_v57 = vmul.f32 1.442695, %v1131_v49  ;;  %1917 = vpow2.f32 %v1254_v16  ;;  %v610_v11 = vadd.f32 %v3095_v24, %v540_v10  ;;  %v1938_v24 = vld [vmem:[%s2262_s28 + $0x30] sm:$0xff] }
 0x350   : > { %v2887_v27 = vadd.f32 %v2738_v13, %v1301_v28  ;;  %1368 = vmatmul.f32.gmra.mxu0 %v2863_v58  ;;  %v2898_v13 = vpop.eup %1903  ;;  %1919 = vpow2.f32 %v1230_v44  ;;  %v2934_v10 = vpop.permute.xlu2 %1502 }
 0x351   : > { %v2903_v40 = vpop.eup %1905  ;;  %v1325_v12 = vadd.f32 %v2898_v13, %v1324_v50  ;;  %1413 = vmatpush.msra.mxu0 %v2803_v23  ;;  %1921 = vpow2.f32 %v1250_v62 }
 0x352   : > { %v2905_v3 = vpop.eup %1907  ;;  %1434 = vmatpush.msra.mxu1 %v2903_v40  ;;  %1923 = vpow2.f32 %v1234_v9 }
 0x353   : > { %v1910_v32 = vpop.eup %1909  ;;  %v1326_v29 = vadd.f32 %v2905_v3, %v1325_v12  ;;  %1414 = vmatpush.msra.mxu0 %v2796_v6  ;;  %1925 = vpow2.f32 %v1246_v57 }
 0x354   : > { %v1912_v20 = vpop.eup %1911  ;;  %1435 = vmatpush.msra.mxu1 %v1910_v32  ;;  %1927 = vpow2.f32 %v1238_v8 }
 0x355   : > { %v1914_v47 = vpop.eup %1913  ;;  %v1327_v23 = vadd.f32 %v1912_v20, %v1326_v29  ;;  %1415 = vmatpush.msra.mxu0 %v2788_v56  ;;  %1929 = vpow2.f32 %v1242_v31 }
 0x356   : > { %v1916_v2 = vpop.eup %1915  ;;  %1436 = vmatpush.msra.mxu1 %v1914_v47 }
 0x357   : > { %v1918_v5 = vpop.eup %1917  ;;  %1394 = vmatmul.f32.gmra.mxu1 %v604_v34  ;;  %v1328_v42 = vadd.f32 %v1916_v2, %v1327_v23  ;;  %1416 = vmatpush.msra.mxu0 %v2776_v26 }
 0x358   : > { %1371 = vmatmul.f32.gmra.mxu0 %v581_v52  ;;  %v1920_v63 = vpop.eup %1919  ;;  %1437 = vmatpush.msra.mxu1 %v1918_v5 }
 0x359   : > { %v1922_v6 = vpop.eup %1921  ;;  %v1329_v48 = vadd.f32 %v1920_v63, %v1328_v42  ;;  %1417 = vmatpush.msra.mxu0 %v2764_v39 }
 0x35a   : > { %v1924_v19 = vpop.eup %1923  ;;  %1438 = vmatpush.msra.mxu1 %v1922_v6 }
 0x35b   : > { %v1926_v14 = vpop.eup %1925  ;;  %v1330_v7 = vadd.f32 %v1924_v19, %v1329_v48  ;;  %1418 = vmatpush.msra.mxu0 %v2751_v37  ;;  %v1937_v48 = vld [vmem:[%s2262_s28 + $0x20] sm:$0xff] }
 0x35c   : > { %v1928_v38 = vpop.eup %1927  ;;  %1439 = vmatpush.msra.mxu1 %v1926_v14 }
 0x35d   : > { %v1930_v56 = vpop.eup %1929  ;;  %v1331_v60 = vadd.f32 %v1928_v38, %v1330_v7  ;;  %1419 = vmatpush.msra.mxu0 %v2742_v51 }
 0x35e   : > { %1440 = vmatpush.msra.mxu1 %v1930_v56 }
 0x35f   : > { %1397 = vmatmul.f32.gmra.mxu1 %v607_v41  ;;  %v1332_v26 = vadd.f32 %v1930_v56, %v1331_v60 }
 0x360   : > { %1420 = vmatmul.f32.vlgmr.msra.gmra.mxu0 %v2812_v15  ;;  %1441 = vmatpush.msra.mxu1 %v1928_v38 }
 0x361   : > { %v1333_v39 = vadd.f32 %v1926_v14, %v1332_v26 }
 0x362   : > { %1442 = vmatpush.msra.mxu1 %v1924_v19 }
 0x363   : > { %v1334_v21 = vadd.f32 %v1922_v6, %v1333_v39 }
 0x364   : > { %1443 = vmatpush.msra.mxu1 %v1920_v63 }
 0x365   : > { %v1335_v37 = vadd.f32 %v1918_v5, %v1334_v21 }
 0x366   : > { %1444 = vmatpush.msra.mxu1 %v1916_v2 }
 0x367   : > { %1400 = vmatmul.f32.gmra.mxu1 %v610_v11  ;;  %v1336_v18 = vadd.f32 %v1914_v47, %v1335_v37 }
 0x368   : > { %1423 = vmatmul.f32.gmra.mxu0 %v2850_v22  ;;  %1445 = vmatpush.msra.mxu1 %v1912_v20  ;;  %v1303_v22 = vrot.slane %v2887_v27, 4 }
 0x369   : > { %v1337_v61 = vadd.f32 %v1910_v32, %v1336_v18  ;;  %v1935_v32 = vld [vmem:[%s2262_s28] sm:$0xff] }
 0x36a   : > { %1446 = vmatpush.msra.mxu1 %v2905_v3  ;;  %v1304_v25 = vadd.f32 %v1303_v22, %v2887_v27 }
 0x36b   : > { %v1338_v51 = vadd.f32 %v2903_v40, %v1337_v61 }
 0x36c   : > { %1447 = vmatpush.msra.mxu1 %v2898_v13  ;;  %v1305_v4 = vrot.slane %v1304_v25, 2 }
 0x36d   : > { %v1339_v15 = vadd.f32 %v2892_v43, %v1338_v51 }
 0x36e   : > { %1448 = vmatpush.msra.mxu1 %v2884_v1  ;;  %v1306_v45 = vadd.f32 %v1305_v4, %v1304_v25 }
 0x36f   : > { %1449 = vmatmul.f32.vlgmr.msra.gmra.mxu1 %v2844_v54  ;;  %v1340_v17 = vrot.slane %v1339_v15, 4 }
 0x370   : > { %1426 = vmatmul.f32.gmra.mxu0 %v2863_v58  ;;  %v1307_v28 = vrot.slane %v1306_v45, 1 }
 0x371   : > { %v1341_v54 = vadd.f32 %v1340_v17, %v1339_v15 }
 0x372   : > { %v1308_v36 = vadd.f32 %v1307_v28, %v1306_v45  ;;  %v1939_v45 = vld [vmem:[%s2262_s28 + $0x8] sm:$0xff] }
 0x373   : > { %v1342_v58 = vrot.slane %v1341_v54, 2 }
 0x374   : > { %1931 = vrcp.f32 %v1308_v36  ;;  %v1473_v53 = vand.u32 2147483648, %v1308_v36  ;;  %vm1467_vm4 = vweird.f32 %v1308_v36  ;;  %v1471_v27 = vand.u32 2147483647, %v1308_v36 }
 0x375   : > { %v1343_v44 = vadd.f32 %v1342_v58, %v1341_v54  ;;  %v1940_v54 = vld [vmem:[%s2262_s28 + $0x18] sm:$0xff] }
 0x376   : > { %v1474_v9 = vor.u32 1.1754944e-38, %v1473_v53  ;;  %vm1472_vm6 = vcmp.eq.f32.partialorder %v1471_v27, 8.507059e+37  ;;  %v1941_v53 = vld [vmem:[%s2262_s28 + $0x28] sm:$0xff] }
 0x377   : > { %1452 = vmatmul.f32.gmra.mxu1 %v604_v34  ;;  %v1344_v46 = vrot.slane %v1343_v44, 1 }
 0x378   : > { %1429 = vmatmul.f32.gmra.mxu0 %v581_v52  ;;  %v1936_v52 = vld [vmem:[%s2262_s28 + $0x10] sm:$0xff] }
 0x379   : > { %v1345_v40 = vadd.f32 %v1344_v46, %v1343_v44 }
 0x37a   : > { %v1932_v0 = vpop.eup %1931 }
 0x37b   : > { %v1463_v30 = vmul.f32 %v1932_v0, %v1308_v36  ;;  %vm1468_vm3 = vweird.f32 %v1932_v0  ;;  %1933 = vrcp.f32 %v1345_v40  ;;  %v1487_v26 = vand.u32 2147483648, %v1345_v40 }
 0x37c   : > { %vm1469_vm5 = vmor %vm1467_vm4, %vm1468_vm3  ;;  %vm1481_vm8 = vweird.f32 %v1345_v40  ;;  %v1485_v21 = vand.u32 2147483647, %v1345_v40 }
 0x37d   : > { %v1464_v16 = vsub.f32 1.0, %v1463_v30  ;;  %v1488_v61 = vor.u32 1.1754944e-38, %v1487_v26 }
 0x37e   : > { %vm1486_vm10 = vcmp.eq.f32.partialorder %v1485_v21, 8.507059e+37 }
 0x37f   : > { %1455 = vmatmul.f32.gmra.mxu1 %v607_v41  ;;  %v1465_v1 = vmul.f32 %v1932_v0, %v1464_v16 }
 0x381   : > { %v1466_v43 = vadd.f32 %v1932_v0, %v1465_v1  ;;  %v1934_v33 = vpop.eup %1933 }
 0x382   : > { %v1477_v23 = vmul.f32 %v1934_v33, %v1345_v40  ;;  %vm1482_vm7 = vweird.f32 %v1934_v33 }
 0x383   : > { %v1470_v62 = vsel %vm1469_vm5, %v1932_v0, %v1466_v43  ;;  %vm1483_vm9 = vmor %vm1481_vm8, %vm1482_vm7 }
 0x384   : > { %v1475_v57 = vsel %vm1472_vm6, %v1474_v9, %v1470_v62  ;;  %v1478_v6 = vsub.f32 1.0, %v1477_v23 }
 0x386   : > { %v1479_v38 = vmul.f32 %v1934_v33, %v1478_v6 }
 0x387   : > { %1458 = vmatmul.f32.gmra.mxu1 %v610_v11 }
 0x388   : > { %v1480_v60 = vadd.f32 %v1934_v33, %v1479_v38 }
 0x38a   : > { %v1484_v37 = vsel %vm1483_vm9, %v1934_v33, %v1480_v60 }
 0x38b   : > { %v1489_v15 = vsel %vm1486_vm10, %v1488_v61, %v1484_v37 }
 0x3b9   : > { %v1363_v49 = vpop.f32.mrf.mxu0 }
 0x3c5   : > { %v1366_v59 = vpop.f32.mrf.mxu0 }
 0x3cb   : > { %v1392_v13 = vpop.f32.mrf.mxu1 }
 0x3cc   : > { %v1393_v50 = vadd.f32 %v1392_v13, %v1363_v49 }
 0x3cd   : > { %v1369_v8 = vpop.f32.mrf.mxu0 }
 0x3ce   : > { %v1490_v3 = vmul.f32 %v1475_v57, %v1393_v50  ;;  %v1942_v50 = vld [vmem:[%s2262_s28 + $0x38] sm:$0xff] }
 0x3d0   : > { %v1505_v12 = vmul.f32 %v2934_v10, %v1490_v3 }
 0x3d2   : > { %v1513_v31 = vadd.f32 %v1935_v32, %v1505_v12 }
 0x3d4   : > { %v1395_v20 = vpop.f32.mrf.mxu1  ;;  %1521 = vst [vmem:[%s2939_s15] sm:$0xff] %v1513_v31 }
 0x3d5   : > { %v1396_v29 = vadd.f32 %v1395_v20, %v1366_v59  ;;  %v1372_v35 = vpop.f32.mrf.mxu0 }
 0x3d7   : > { %v1492_v47 = vmul.f32 %v1475_v57, %v1396_v29 }
 0x3d9   : > { %v1507_v34 = vmul.f32 %v2934_v10, %v1492_v47 }
 0x3db   : > { %v1515_v2 = vadd.f32 %v1936_v52, %v1507_v34 }
 0x3dc   : > { %v1398_v5 = vpop.f32.mrf.mxu1 }
 0x3dd   : > { %1523 = vst [vmem:[%s2939_s15 + $0x10] sm:$0xff] %v1515_v2  ;;  %v1399_v63 = vadd.f32 %v1398_v5, %v1369_v8  ;;  %v1421_v56 = vpop.f32.mrf.mxu0 }
 0x3df   : > { %v1494_v42 = vmul.f32 %v1475_v57, %v1399_v63 }
 0x3e1   : > { %v1509_v19 = vmul.f32 %v2934_v10, %v1494_v42 }
 0x3e3   : > { %v1517_v14 = vadd.f32 %v1937_v48, %v1509_v19 }
 0x3e4   : > { %v1401_v7 = vpop.f32.mrf.mxu1 }
 0x3e5   : > { %1525 = vst [vmem:[%s2939_s15 + $0x20] sm:$0xff] %v1517_v14  ;;  %v1402_v55 = vadd.f32 %v1401_v7, %v1372_v35  ;;  %v1424_v22 = vpop.f32.mrf.mxu0 }
 0x3e7   : > { %v1496_v41 = vmul.f32 %v1475_v57, %v1402_v55 }
 0x3e9   : > { %v1511_v39 = vmul.f32 %v2934_v10, %v1496_v41 }
 0x3eb   : > { %v1519_v11 = vadd.f32 %v1938_v24, %v1511_v39 }
 0x3ec   : > { %v1450_v18 = vpop.f32.mrf.mxu1 }
 0x3ed   : > { %1527 = vst [vmem:[%s2939_s15 + $0x30] sm:$0xff] %v1519_v11  ;;  %v1451_v51 = vadd.f32 %v1450_v18, %v1421_v56  ;;  %v1427_v30 = vpop.f32.mrf.mxu0 }
 0x3ef   : > { %v1491_v25 = vmul.f32 %v1489_v15, %v1451_v51 }
 0x3f1   : > { %v1506_v4 = vmul.f32 %v2934_v10, %v1491_v25 }
 0x3f3   : > { %v1514_v28 = vadd.f32 %v1939_v45, %v1506_v4 }
 0x3f4   : > { %v1453_v36 = vpop.f32.mrf.mxu1 }
 0x3f5   : > { %1522 = vst [vmem:[%s2939_s15 + $0x8] sm:$0xff] %v1514_v28  ;;  %v1454_v0 = vadd.f32 %v1453_v36, %v1424_v22  ;;  %v1430_v43 = vpop.f32.mrf.mxu0 }
 0x3f7   : > { %v1493_v17 = vmul.f32 %v1489_v15, %v1454_v0 }
 0x3f9   : > { %v1508_v49 = vmul.f32 %v2934_v10, %v1493_v17 }
 0x3fb   : > { %v1516_v16 = vadd.f32 %v1940_v54, %v1508_v49 }
 0x3fc   : > { %v1456_v58 = vpop.f32.mrf.mxu1 }
 0x3fd   : > { %1524 = vst [vmem:[%s2939_s15 + $0x18] sm:$0xff] %v1516_v16  ;;  %v1457_v1 = vadd.f32 %v1456_v58, %v1427_v30 }
 0x3ff   : > { %v1495_v44 = vmul.f32 %v1489_v15, %v1457_v1 }
 0x401   : > { %v1510_v59 = vmul.f32 %v2934_v10, %v1495_v44 }
 0x403   : > { %v1518_v27 = vadd.f32 %v1941_v53, %v1510_v59 }
 0x404   : > { %v1459_v46 = vpop.f32.mrf.mxu1 }
 0x405   : > { %1526 = vst [vmem:[%s2939_s15 + $0x28] sm:$0xff] %v1518_v27  ;;  %v1460_v62 = vadd.f32 %v1459_v46, %v1430_v43 }
 0x407   : > { %v1497_v13 = vmul.f32 %v1489_v15, %v1460_v62 }
 0x409   : > { %v1512_v9 = vmul.f32 %v2934_v10, %v1497_v13 }
 0x40b   : > { %v1520_v40 = vadd.f32 %v1942_v50, %v1512_v9 }
 0x40d   : > { %1528 = vst [vmem:[%s2939_s15 + $0x38] sm:$0xff] %v1520_v40 }
 0x40e   : > { %2030 = shalt.err (!%p2027_p0)
}
 0x40f   : > { %s2078_s0 = smov 256   ;;  %s2079_s28 = smov 16  }
 0x410   : > { %1746 = dma.vmem_to_hbm [thread:$0]  (%p2183_p11), %s1543_s20, 1024, %s1545_s11, %s1530_s8, %s2078_s0, %s2078_s0, %s2079_s28  }
 0x411 PF: > { %s3096_s29 = sld [smem:[#allocation12_spill]]  ;;  %p3098_p1 = scmp.ge.s32.totalorder %s2073_s14, 2 }
 0x413   : > { %p1756_p4 = pnand %p3098_p1, %p2187_p12 }
 0x415   : > { %p1757_p7 = pneg %p1756_p4 }
 0x417   : > { %s1559_s30 = sand.u32 1, %s3096_s29  }
 0x418   : > { %s1560_s15 = scalar_lea.sflag [#allocation5], %s1559_s30 }
 0x419   : > { %2056 = dma.done.wait (%p1757_p7), %s1560_s15, 1024  }
 0x41a   : > { %2058 = vsyncadd (%p1757_p7), %s1560_s15, 4294966272  ;;  %s3099_s14 = sld [smem:[#allocation14_spill]]  ;;  %s3102_s11 = smov %s2065_s12 }
 0x41b   : > { %s3100_s24 = sld [smem:[#allocation13_spill]] }
 0x41c   : > { %s3101_s13 = sld [smem:[#allocation15_spill]] }
 0x420   : > { %p27_p5 = scmp.ge.s32.totalorder %s3099_s14, 4  }
 0x421   : > { %s3103_s12 = smov %s3100_s24 }
 0x422   :  { %29 = sbr.rel (!%p27_p5) target bundleno = 10 (0xa), region = 114 }
 0x427   :  { %1566 = vsyncpa [#allocation4], 1 }
 0x428   :  { %1568 = vsyncpa [#allocation4 + $0x1], 1 }
 0x429   :  { %1569 = vsyncpa [#allocation7], 1 }
 0x42a   :  { %1571 = vsyncpa [#allocation7 + $0x1], 1 }
 0x42b   :  { %1572 = vsyncpa [#allocation5], 1 }
 0x42c   :  { %1574 = vsyncpa [#allocation5 + $0x1], 1 }

</bundles_post_ra>
